<compile_context>
chip_gen: v5e
topology: v5e:2x2
jax: 0.10.0
libtpu: 0.0.40
codegen_flags: <defaults>
</compile_context>

<pallas_src>
import numpy as np
import jax
import jax.numpy as jnp
from jax import lax
from jax.experimental import pallas as pl
from jax.experimental.pallas import tpu as pltpu


def _ct0(a, w):
    # Contract a's axis 0 with w's axis 0 (== a.T @ w) without an explicit transpose.
    return lax.dot_general(a, w, (((0,), (0,)), ((), ())),
                           preferred_element_type=jnp.float32)


def _build_kernel(B, S):
    def kernel(x_ref, w1a_ref, b1a_ref, w1b_ref, b1b_ref,
               w2a_ref, b2a_ref, w2b_ref, b2b_ref,
               wo_head_ref, bo_ref, o_ref, flat_ref):
        H = w1b_ref.shape[1]

        # L2DST_1.dense1 + tanh for the whole batch in one MXU matmul: (B*S,F) @ (F,P).
        h0 = jnp.tanh(jnp.dot(x_ref[...], w1a_ref[...],
                              preferred_element_type=jnp.float32) + b1a_ref[...])

        w1b = w1b_ref[...]; b1b = b1b_ref[...]
        w2a = w2a_ref[...]; b2a = b2a_ref[...]
        w2b = w2b_ref[...]; b2b = b2b_ref[...]

        # Per-sample transposed-contraction chain (B is tiny & static -> fully unrolled).
        for b in range(B):
            h = h0[b * S:(b + 1) * S, :]                        # (S, P)
            # transpose(-1,-2) folded into the contraction; L2DST_1.dense2 + tanh
            h = jnp.tanh(_ct0(h, w1b) + b1b)                    # (P, H)
            # L2DST_2.dense1 + tanh (acts on transposed L2DST_1 output)
            h = jnp.tanh(_ct0(h, w2a) + b2a)                    # (H, H)
            # L2DST_2.dense2 + tanh -> final activation, pre the model's last transpose
            h = jnp.tanh(_ct0(h, w2b) + b2b)                    # (H, H)
            # Row-major flatten into this sample's scratch row (the model's final
            # transpose+flatten is pre-folded into wo_head, so row-major is correct).
            for a in range(H):
                flat_ref[b:b + 1, a * H:(a + 1) * H] = h[a:a + 1, :]

        # Fused classifier head: one lane-dense (B, H*H) x (C, H*H)^T MXU matmul (K=H*H).
        logits = lax.dot_general(flat_ref[...], wo_head_ref[...],
                                 (((1,), (1,)), ((), ())),
                                 preferred_element_type=jnp.float32) + bo_ref[...]

        # log_softmax over classes (dropout before W_o = identity in eval mode).
        m = jnp.max(logits, axis=1, keepdims=True)
        s = logits - m
        lse = jnp.log(jnp.sum(jnp.exp(s), axis=1, keepdims=True))
        o_ref[...] = (s - lse).astype(o_ref.dtype)              # single (B, C) store

    return kernel


def lst2_forward(x, p):
    B, S, F = x.shape
    P = p["w1a"].shape[1]                 # input_size
    H = p["w1b"].shape[1]                 # hidden_size
    C = p["wo_head"].shape[0]             # num_classes

    # Shape sanity: the LazyLinear in-features of each layer are fixed by the data layout.
    assert p["w1a"].shape == (F, P)
    assert p["w1b"].shape == (S, H)
    assert p["w2a"].shape == (P, H)
    assert p["w2b"].shape == (H, H)
    assert p["wo_head"].shape == (C, H * H)

    x2 = x.reshape(B * S, F)              # contiguous reshape on the host side (free)

    fused = pl.pallas_call(
        _build_kernel(B, S),
        out_shape=jax.ShapeDtypeStruct((B, C), jnp.float32),
        grid=(1,),                        # single step: whole batch per invocation
        in_specs=[
            pl.BlockSpec((B * S, F), lambda i: (0, 0)),
            pl.BlockSpec((F, P), lambda i: (0, 0)),
            pl.BlockSpec((1, P), lambda i: (0, 0)),
            pl.BlockSpec((S, H), lambda i: (0, 0)),
            pl.BlockSpec((1, H), lambda i: (0, 0)),
            pl.BlockSpec((P, H), lambda i: (0, 0)),
            pl.BlockSpec((1, H), lambda i: (0, 0)),
            pl.BlockSpec((H, H), lambda i: (0, 0)),
            pl.BlockSpec((1, H), lambda i: (0, 0)),
            pl.BlockSpec((C, H * H), lambda i: (0, 0)),
            pl.BlockSpec((1, C), lambda i: (0, 0)),
        ],
        out_specs=pl.BlockSpec((B, C), lambda i: (0, 0)),
        scratch_shapes=[pltpu.VMEM((B, H * H), jnp.float32)],   # flattened activations
        compiler_params=pltpu.CompilerParams(
            dimension_semantics=("arbitrary",)),
    )
    return fused(x2, p["w1a"], p["b1a"], p["w1b"], p["b1b"],
                 p["w2a"], p["b2a"], p["w2b"], p["b2b"],
                 p["wo_head"], p["bo"])


def init_params(key, F, S, input_size, hidden, num_classes):
    ks = jax.random.split(key, 10)

    def lin(kw, kb, fan_in, fan_out):
        bound = 1.0 / np.sqrt(fan_in)
        w = jax.random.uniform(kw, (fan_in, fan_out), jnp.float32, -bound, bound)
        b = jax.random.uniform(kb, (1, fan_out), jnp.float32, -bound, bound)
        return w, b

    w1a, b1a = lin(ks[0], ks[1], F, input_size)            # L2DST_1.dense1
    w1b, b1b = lin(ks[2], ks[3], S, hidden)                # L2DST_1.dense2
    w2a, b2a = lin(ks[4], ks[5], input_size, hidden)       # L2DST_2.dense1
    w2b, b2b = lin(ks[6], ks[7], hidden, hidden)           # L2DST_2.dense2
    fan_in, fan_out = hidden * hidden, num_classes
    gain = np.sqrt(6.0 / (fan_in + fan_out))               # xavier_uniform
    wo = jax.random.uniform(ks[8], (fan_in, fan_out), jnp.float32, -gain, gain)
    bb = 1.0 / np.sqrt(fan_in)
    bo = jax.random.uniform(ks[9], (1, fan_out), jnp.float32, -bb, bb)

    # One-time host-side weight permutation folding the model's final transpose(-2,-1) +
    # flatten into a 2-D, lane-dense head weight:  wo_head[c, a*H + b] = wo[b*H + a, c].
    wo_head = wo.T.reshape(num_classes, hidden, hidden).transpose(0, 2, 1) \
                  .reshape(num_classes, hidden * hidden)

    return dict(w1a=w1a, b1a=b1a, w1b=w1b, b1b=b1b,
                w2a=w2a, b2a=b2a, w2b=w2b, b2b=b2b,
                wo=wo, bo=bo, wo_head=wo_head)


def lst2_reference(x, p):
    # Pure-JAX reference mirroring the PyTorch forward (eval mode: dropout = identity).
    def l2dst(X, w1, b1, w2, b2):
        out = jnp.tanh(X @ w1 + b1)
        out = jnp.swapaxes(out, -1, -2)
        out = jnp.tanh(out @ w2 + b2)
        return jnp.swapaxes(out, -2, -1)
    out = l2dst(x, p["w1a"], p["b1a"][0], p["w1b"], p["b1b"][0])
    out = l2dst(out, p["w2a"], p["b2a"][0], p["w2b"], p["b2b"][0])
    out = out.reshape(out.shape[0], -1)
    logits = out @ p["wo"] + p["bo"][0]
    return jax.nn.log_softmax(logits, axis=1)


if __name__ == "__main__":
    # TODO(synk): dropout layers (p=0.1) are modeled in eval mode (identity), since the
    # PyTorch RNG stream for training-mode dropout cannot be reproduced bit-exactly.
    B, S, F = 2, 8, 16
    input_size, hidden, num_classes = 16, 32, 10

    key = jax.random.PRNGKey(0)
    kx, kp = jax.random.split(key)
    x = jax.random.normal(kx, (B, S, F), jnp.float32)
    params = init_params(kp, F, S, input_size, hidden, num_classes)

    out = jax.block_until_ready(lst2_forward(x, params))
    ref = jax.block_until_ready(lst2_reference(x, params))

    assert out.shape == (B, num_classes)
    np.testing.assert_allclose(np.asarray(out), np.asarray(ref), rtol=1e-5, atol=1e-5)
    print("KERNEL_OK")
</pallas_src>

<mosaic_0001>
module attributes {stable_mosaic.version = 11 : i64} {
  func.func @kernel(%arg0: i32, %arg1: memref<16x16xf32, #tpu.memory_space<vmem>>, %arg2: memref<16x16xf32, #tpu.memory_space<vmem>>, %arg3: memref<1x16xf32, #tpu.memory_space<vmem>>, %arg4: memref<8x32xf32, #tpu.memory_space<vmem>>, %arg5: memref<1x32xf32, #tpu.memory_space<vmem>>, %arg6: memref<16x32xf32, #tpu.memory_space<vmem>>, %arg7: memref<1x32xf32, #tpu.memory_space<vmem>>, %arg8: memref<32x32xf32, #tpu.memory_space<vmem>>, %arg9: memref<1x32xf32, #tpu.memory_space<vmem>>, %arg10: memref<10x1024xf32, #tpu.memory_space<vmem>>, %arg11: memref<1x10xf32, #tpu.memory_space<vmem>>, %arg12: memref<2x10xf32, #tpu.memory_space<vmem>>, %arg13: memref<2x1024xf32, #tpu.memory_space<vmem>>) attributes {dimension_semantics = [#tpu.dimension_semantics<arbitrary>], iteration_bounds = array<i64: 1>, scalar_prefetch = 0 : i64, scratch_operands = 1 : i64, tpu.core_type = #tpu.core_type<tc>, window_params = [{pipeline_mode = #tpu.pipeline_mode<synchronous>, transform_indices = @transform_0, window_bounds = array<i64: 16, 16>}, {pipeline_mode = #tpu.pipeline_mode<synchronous>, transform_indices = @transform_1, window_bounds = array<i64: 16, 16>}, {pipeline_mode = #tpu.pipeline_mode<synchronous>, transform_indices = @transform_2, window_bounds = array<i64: 1, 16>}, {pipeline_mode = #tpu.pipeline_mode<synchronous>, transform_indices = @transform_3, window_bounds = array<i64: 8, 32>}, {pipeline_mode = #tpu.pipeline_mode<synchronous>, transform_indices = @transform_4, window_bounds = array<i64: 1, 32>}, {pipeline_mode = #tpu.pipeline_mode<synchronous>, transform_indices = @transform_5, window_bounds = array<i64: 16, 32>}, {pipeline_mode = #tpu.pipeline_mode<synchronous>, transform_indices = @transform_6, window_bounds = array<i64: 1, 32>}, {pipeline_mode = #tpu.pipeline_mode<synchronous>, transform_indices = @transform_7, window_bounds = array<i64: 32, 32>}, {pipeline_mode = #tpu.pipeline_mode<synchronous>, transform_indices = @transform_8, window_bounds = array<i64: 1, 32>}, {pipeline_mode = #tpu.pipeline_mode<synchronous>, transform_indices = @transform_9, window_bounds = array<i64: 10, 1024>}, {pipeline_mode = #tpu.pipeline_mode<synchronous>, transform_indices = @transform_10, window_bounds = array<i64: 1, 10>}, {pipeline_mode = #tpu.pipeline_mode<synchronous>, transform_indices = @transform_11, window_bounds = array<i64: 2, 10>}]} {
    %c0 = arith.constant 0 : index
    %c0_0 = arith.constant 0 : index
    %0 = vector.load %arg1[%c0, %c0_0] : memref<16x16xf32, #tpu.memory_space<vmem>>, vector<16x16xf32>
    %c0_1 = arith.constant 0 : index
    %c0_2 = arith.constant 0 : index
    %1 = vector.load %arg2[%c0_1, %c0_2] : memref<16x16xf32, #tpu.memory_space<vmem>>, vector<16x16xf32>
    %cst = arith.constant dense<0.000000e+00> : vector<16x16xf32>
    %2 = tpu.matmul %0, %1, %cst {dimension_numbers = #tpu.dot_dimension_numbers<[1], [0], [0], [1], [0, 0, 1, 1], [], []>} : vector<16x16xf32>, vector<16x16xf32>, vector<16x16xf32> -> vector<16x16xf32>
    %c0_3 = arith.constant 0 : index
    %c0_4 = arith.constant 0 : index
    %3 = vector.load %arg3[%c0_3, %c0_4] : memref<1x16xf32, #tpu.memory_space<vmem>>, vector<1x16xf32>
    %4 = vector.broadcast %3 : vector<1x16xf32> to vector<16x16xf32>
    %5 = arith.addf %2, %4 : vector<16x16xf32>
    %6 = math.tanh %5 : vector<16x16xf32>
    %c0_5 = arith.constant 0 : index
    %c0_6 = arith.constant 0 : index
    %7 = vector.load %arg4[%c0_5, %c0_6] : memref<8x32xf32, #tpu.memory_space<vmem>>, vector<8x32xf32>
    %c0_7 = arith.constant 0 : index
    %c0_8 = arith.constant 0 : index
    %8 = vector.load %arg5[%c0_7, %c0_8] : memref<1x32xf32, #tpu.memory_space<vmem>>, vector<1x32xf32>
    %c0_9 = arith.constant 0 : index
    %c0_10 = arith.constant 0 : index
    %9 = vector.load %arg6[%c0_9, %c0_10] : memref<16x32xf32, #tpu.memory_space<vmem>>, vector<16x32xf32>
    %c0_11 = arith.constant 0 : index
    %c0_12 = arith.constant 0 : index
    %10 = vector.load %arg7[%c0_11, %c0_12] : memref<1x32xf32, #tpu.memory_space<vmem>>, vector<1x32xf32>
    %c0_13 = arith.constant 0 : index
    %c0_14 = arith.constant 0 : index
    %11 = vector.load %arg8[%c0_13, %c0_14] : memref<32x32xf32, #tpu.memory_space<vmem>>, vector<32x32xf32>
    %c0_15 = arith.constant 0 : index
    %c0_16 = arith.constant 0 : index
    %12 = vector.load %arg9[%c0_15, %c0_16] : memref<1x32xf32, #tpu.memory_space<vmem>>, vector<1x32xf32>
    %13 = vector.extract_strided_slice %6 {offsets = [0, 0], sizes = [8, 16], strides = [1, 1]} : vector<16x16xf32> to vector<8x16xf32>
    %cst_17 = arith.constant dense<0.000000e+00> : vector<16x32xf32>
    %14 = tpu.matmul %13, %7, %cst_17 {dimension_numbers = #tpu.dot_dimension_numbers<[0], [0], [1], [1], [0, 1, 1, 1], [], []>} : vector<8x16xf32>, vector<8x32xf32>, vector<16x32xf32> -> vector<16x32xf32>
    %15 = vector.broadcast %8 : vector<1x32xf32> to vector<16x32xf32>
    %16 = arith.addf %14, %15 : vector<16x32xf32>
    %17 = math.tanh %16 : vector<16x32xf32>
    %cst_18 = arith.constant dense<0.000000e+00> : vector<32x32xf32>
    %18 = tpu.matmul %17, %9, %cst_18 {dimension_numbers = #tpu.dot_dimension_numbers<[0], [0], [1], [1], [0, 1, 1, 1], [], []>} : vector<16x32xf32>, vector<16x32xf32>, vector<32x32xf32> -> vector<32x32xf32>
    %19 = vector.broadcast %10 : vector<1x32xf32> to vector<32x32xf32>
    %20 = arith.addf %18, %19 : vector<32x32xf32>
    %21 = math.tanh %20 : vector<32x32xf32>
    %cst_19 = arith.constant dense<0.000000e+00> : vector<32x32xf32>
    %22 = tpu.matmul %21, %11, %cst_19 {dimension_numbers = #tpu.dot_dimension_numbers<[0], [0], [1], [1], [0, 1, 1, 1], [], []>} : vector<32x32xf32>, vector<32x32xf32>, vector<32x32xf32> -> vector<32x32xf32>
    %23 = vector.broadcast %12 : vector<1x32xf32> to vector<32x32xf32>
    %24 = arith.addf %22, %23 : vector<32x32xf32>
    %25 = math.tanh %24 : vector<32x32xf32>
    %26 = vector.extract_strided_slice %25 {offsets = [0, 0], sizes = [1, 32], strides = [1, 1]} : vector<32x32xf32> to vector<1x32xf32>
    %c0_20 = arith.constant 0 : index
    %c0_21 = arith.constant 0 : index
    %27 = vector.load %arg13[%c0_20, %c0_21] : memref<2x1024xf32, #tpu.memory_space<vmem>>, vector<1x32xf32>
    tpu.vector_store %arg13[%c0_20, %c0_21], %26 {strides = array<i32>} : memref<2x1024xf32, #tpu.memory_space<vmem>>, vector<1x32xf32>,
    %28 = vector.extract_strided_slice %25 {offsets = [1, 0], sizes = [1, 32], strides = [1, 1]} : vector<32x32xf32> to vector<1x32xf32>
    %c0_22 = arith.constant 0 : index
    %c32 = arith.constant 32 : index
    %29 = vector.load %arg13[%c0_22, %c32] : memref<2x1024xf32, #tpu.memory_space<vmem>>, vector<1x32xf32>
    tpu.vector_store %arg13[%c0_22, %c32], %28 {strides = array<i32>} : memref<2x1024xf32, #tpu.memory_space<vmem>>, vector<1x32xf32>,
    %30 = vector.extract_strided_slice %25 {offsets = [2, 0], sizes = [1, 32], strides = [1, 1]} : vector<32x32xf32> to vector<1x32xf32>
    %c0_23 = arith.constant 0 : index
    %c64 = arith.constant 64 : index
    %31 = vector.load %arg13[%c0_23, %c64] : memref<2x1024xf32, #tpu.memory_space<vmem>>, vector<1x32xf32>
    tpu.vector_store %arg13[%c0_23, %c64], %30 {strides = array<i32>} : memref<2x1024xf32, #tpu.memory_space<vmem>>, vector<1x32xf32>,
    %32 = vector.extract_strided_slice %25 {offsets = [3, 0], sizes = [1, 32], strides = [1, 1]} : vector<32x32xf32> to vector<1x32xf32>
    %c0_24 = arith.constant 0 : index
    %c96 = arith.constant 96 : index
    %33 = vector.load %arg13[%c0_24, %c96] : memref<2x1024xf32, #tpu.memory_space<vmem>>, vector<1x32xf32>
    tpu.vector_store %arg13[%c0_24, %c96], %32 {strides = array<i32>} : memref<2x1024xf32, #tpu.memory_space<vmem>>, vector<1x32xf32>,
    %34 = vector.extract_strided_slice %25 {offsets = [4, 0], sizes = [1, 32], strides = [1, 1]} : vector<32x32xf32> to vector<1x32xf32>
    %c0_25 = arith.constant 0 : index
    %c128 = arith.constant 128 : index
    %35 = vector.load %arg13[%c0_25, %c128] : memref<2x1024xf32, #tpu.memory_space<vmem>>, vector<1x32xf32>
    tpu.vector_store %arg13[%c0_25, %c128], %34 {strides = array<i32>} : memref<2x1024xf32, #tpu.memory_space<vmem>>, vector<1x32xf32>,
    %36 = vector.extract_strided_slice %25 {offsets = [5, 0], sizes = [1, 32], strides = [1, 1]} : vector<32x32xf32> to vector<1x32xf32>
    %c0_26 = arith.constant 0 : index
    %c160 = arith.constant 160 : index
    %37 = vector.load %arg13[%c0_26, %c160] : memref<2x1024xf32, #tpu.memory_space<vmem>>, vector<1x32xf32>
    tpu.vector_store %arg13[%c0_26, %c160], %36 {strides = array<i32>} : memref<2x1024xf32, #tpu.memory_space<vmem>>, vector<1x32xf32>,
    %38 = vector.extract_strided_slice %25 {offsets = [6, 0], sizes = [1, 32], strides = [1, 1]} : vector<32x32xf32> to vector<1x32xf32>
    %c0_27 = arith.constant 0 : index
    %c192 = arith.constant 192 : index
    %39 = vector.load %arg13[%c0_27, %c192] : memref<2x1024xf32, #tpu.memory_space<vmem>>, vector<1x32xf32>
    tpu.vector_store %arg13[%c0_27, %c192], %38 {strides = array<i32>} : memref<2x1024xf32, #tpu.memory_space<vmem>>, vector<1x32xf32>,
    %40 = vector.extract_strided_slice %25 {offsets = [7, 0], sizes = [1, 32], strides = [1, 1]} : vector<32x32xf32> to vector<1x32xf32>
    %c0_28 = arith.constant 0 : index
    %c224 = arith.constant 224 : index
    %41 = vector.load %arg13[%c0_28, %c224] : memref<2x1024xf32, #tpu.memory_space<vmem>>, vector<1x32xf32>
    tpu.vector_store %arg13[%c0_28, %c224], %40 {strides = array<i32>} : memref<2x1024xf32, #tpu.memory_space<vmem>>, vector<1x32xf32>,
    %42 = vector.extract_strided_slice %25 {offsets = [8, 0], sizes = [1, 32], strides = [1, 1]} : vector<32x32xf32> to vector<1x32xf32>
    %c0_29 = arith.constant 0 : index
    %c256 = arith.constant 256 : index
    %43 = vector.load %arg13[%c0_29, %c256] : memref<2x1024xf32, #tpu.memory_space<vmem>>, vector<1x32xf32>
    tpu.vector_store %arg13[%c0_29, %c256], %42 {strides = array<i32>} : memref<2x1024xf32, #tpu.memory_space<vmem>>, vector<1x32xf32>,
    %44 = vector.extract_strided_slice %25 {offsets = [9, 0], sizes = [1, 32], strides = [1, 1]} : vector<32x32xf32> to vector<1x32xf32>
    %c0_30 = arith.constant 0 : index
    %c288 = arith.constant 288 : index
    %45 = vector.load %arg13[%c0_30, %c288] : memref<2x1024xf32, #tpu.memory_space<vmem>>, vector<1x32xf32>
    tpu.vector_store %arg13[%c0_30, %c288], %44 {strides = array<i32>} : memref<2x1024xf32, #tpu.memory_space<vmem>>, vector<1x32xf32>,
    %46 = vector.extract_strided_slice %25 {offsets = [10, 0], sizes = [1, 32], strides = [1, 1]} : vector<32x32xf32> to vector<1x32xf32>
    %c0_31 = arith.constant 0 : index
    %c320 = arith.constant 320 : index
    %47 = vector.load %arg13[%c0_31, %c320] : memref<2x1024xf32, #tpu.memory_space<vmem>>, vector<1x32xf32>
    tpu.vector_store %arg13[%c0_31, %c320], %46 {strides = array<i32>} : memref<2x1024xf32, #tpu.memory_space<vmem>>, vector<1x32xf32>,
    %48 = vector.extract_strided_slice %25 {offsets = [11, 0], sizes = [1, 32], strides = [1, 1]} : vector<32x32xf32> to vector<1x32xf32>
    %c0_32 = arith.constant 0 : index
    %c352 = arith.constant 352 : index
    %49 = vector.load %arg13[%c0_32, %c352] : memref<2x1024xf32, #tpu.memory_space<vmem>>, vector<1x32xf32>
    tpu.vector_store %arg13[%c0_32, %c352], %48 {strides = array<i32>} : memref<2x1024xf32, #tpu.memory_space<vmem>>, vector<1x32xf32>,
    %50 = vector.extract_strided_slice %25 {offsets = [12, 0], sizes = [1, 32], strides = [1, 1]} : vector<32x32xf32> to vector<1x32xf32>
    %c0_33 = arith.constant 0 : index
    %c384 = arith.constant 384 : index
    %51 = vector.load %arg13[%c0_33, %c384] : memref<2x1024xf32, #tpu.memory_space<vmem>>, vector<1x32xf32>
    tpu.vector_store %arg13[%c0_33, %c384], %50 {strides = array<i32>} : memref<2x1024xf32, #tpu.memory_space<vmem>>, vector<1x32xf32>,
    %52 = vector.extract_strided_slice %25 {offsets = [13, 0], sizes = [1, 32], strides = [1, 1]} : vector<32x32xf32> to vector<1x32xf32>
    %c0_34 = arith.constant 0 : index
    %c416 = arith.constant 416 : index
    %53 = vector.load %arg13[%c0_34, %c416] : memref<2x1024xf32, #tpu.memory_space<vmem>>, vector<1x32xf32>
    tpu.vector_store %arg13[%c0_34, %c416], %52 {strides = array<i32>} : memref<2x1024xf32, #tpu.memory_space<vmem>>, vector<1x32xf32>,
    %54 = vector.extract_strided_slice %25 {offsets = [14, 0], sizes = [1, 32], strides = [1, 1]} : vector<32x32xf32> to vector<1x32xf32>
    %c0_35 = arith.constant 0 : index
    %c448 = arith.constant 448 : index
    %55 = vector.load %arg13[%c0_35, %c448] : memref<2x1024xf32, #tpu.memory_space<vmem>>, vector<1x32xf32>
    tpu.vector_store %arg13[%c0_35, %c448], %54 {strides = array<i32>} : memref<2x1024xf32, #tpu.memory_space<vmem>>, vector<1x32xf32>,
    %56 = vector.extract_strided_slice %25 {offsets = [15, 0], sizes = [1, 32], strides = [1, 1]} : vector<32x32xf32> to vector<1x32xf32>
    %c0_36 = arith.constant 0 : index
    %c480 = arith.constant 480 : index
    %57 = vector.load %arg13[%c0_36, %c480] : memref<2x1024xf32, #tpu.memory_space<vmem>>, vector<1x32xf32>
    tpu.vector_store %arg13[%c0_36, %c480], %56 {strides = array<i32>} : memref<2x1024xf32, #tpu.memory_space<vmem>>, vector<1x32xf32>,
    %58 = vector.extract_strided_slice %25 {offsets = [16, 0], sizes = [1, 32], strides = [1, 1]} : vector<32x32xf32> to vector<1x32xf32>
    %c0_37 = arith.constant 0 : index
    %c512 = arith.constant 512 : index
    %59 = vector.load %arg13[%c0_37, %c512] : memref<2x1024xf32, #tpu.memory_space<vmem>>, vector<1x32xf32>
    tpu.vector_store %arg13[%c0_37, %c512], %58 {strides = array<i32>} : memref<2x1024xf32, #tpu.memory_space<vmem>>, vector<1x32xf32>,
    %60 = vector.extract_strided_slice %25 {offsets = [17, 0], sizes = [1, 32], strides = [1, 1]} : vector<32x32xf32> to vector<1x32xf32>
    %c0_38 = arith.constant 0 : index
    %c544 = arith.constant 544 : index
    %61 = vector.load %arg13[%c0_38, %c544] : memref<2x1024xf32, #tpu.memory_space<vmem>>, vector<1x32xf32>
    tpu.vector_store %arg13[%c0_38, %c544], %60 {strides = array<i32>} : memref<2x1024xf32, #tpu.memory_space<vmem>>, vector<1x32xf32>,
    %62 = vector.extract_strided_slice %25 {offsets = [18, 0], sizes = [1, 32], strides = [1, 1]} : vector<32x32xf32> to vector<1x32xf32>
    %c0_39 = arith.constant 0 : index
    %c576 = arith.constant 576 : index
    %63 = vector.load %arg13[%c0_39, %c576] : memref<2x1024xf32, #tpu.memory_space<vmem>>, vector<1x32xf32>
    tpu.vector_store %arg13[%c0_39, %c576], %62 {strides = array<i32>} : memref<2x1024xf32, #tpu.memory_space<vmem>>, vector<1x32xf32>,
    %64 = vector.extract_strided_slice %25 {offsets = [19, 0], sizes = [1, 32], strides = [1, 1]} : vector<32x32xf32> to vector<1x32xf32>
    %c0_40 = arith.constant 0 : index
    %c608 = arith.constant 608 : index
    %65 = vector.load %arg13[%c0_40, %c608] : memref<2x1024xf32, #tpu.memory_space<vmem>>, vector<1x32xf32>
    tpu.vector_store %arg13[%c0_40, %c608], %64 {strides = array<i32>} : memref<2x1024xf32, #tpu.memory_space<vmem>>, vector<1x32xf32>,
    %66 = vector.extract_strided_slice %25 {offsets = [20, 0], sizes = [1, 32], strides = [1, 1]} : vector<32x32xf32> to vector<1x32xf32>
    %c0_41 = arith.constant 0 : index
    %c640 = arith.constant 640 : index
    %67 = vector.load %arg13[%c0_41, %c640] : memref<2x1024xf32, #tpu.memory_space<vmem>>, vector<1x32xf32>
    tpu.vector_store %arg13[%c0_41, %c640], %66 {strides = array<i32>} : memref<2x1024xf32, #tpu.memory_space<vmem>>, vector<1x32xf32>,
    %68 = vector.extract_strided_slice %25 {offsets = [21, 0], sizes = [1, 32], strides = [1, 1]} : vector<32x32xf32> to vector<1x32xf32>
    %c0_42 = arith.constant 0 : index
    %c672 = arith.constant 672 : index
    %69 = vector.load %arg13[%c0_42, %c672] : memref<2x1024xf32, #tpu.memory_space<vmem>>, vector<1x32xf32>
    tpu.vector_store %arg13[%c0_42, %c672], %68 {strides = array<i32>} : memref<2x1024xf32, #tpu.memory_space<vmem>>, vector<1x32xf32>,
    %70 = vector.extract_strided_slice %25 {offsets = [22, 0], sizes = [1, 32], strides = [1, 1]} : vector<32x32xf32> to vector<1x32xf32>
    %c0_43 = arith.constant 0 : index
    %c704 = arith.constant 704 : index
    %71 = vector.load %arg13[%c0_43, %c704] : memref<2x1024xf32, #tpu.memory_space<vmem>>, vector<1x32xf32>
    tpu.vector_store %arg13[%c0_43, %c704], %70 {strides = array<i32>} : memref<2x1024xf32, #tpu.memory_space<vmem>>, vector<1x32xf32>,
    %72 = vector.extract_strided_slice %25 {offsets = [23, 0], sizes = [1, 32], strides = [1, 1]} : vector<32x32xf32> to vector<1x32xf32>
    %c0_44 = arith.constant 0 : index
    %c736 = arith.constant 736 : index
    %73 = vector.load %arg13[%c0_44, %c736] : memref<2x1024xf32, #tpu.memory_space<vmem>>, vector<1x32xf32>
    tpu.vector_store %arg13[%c0_44, %c736], %72 {strides = array<i32>} : memref<2x1024xf32, #tpu.memory_space<vmem>>, vector<1x32xf32>,
    %74 = vector.extract_strided_slice %25 {offsets = [24, 0], sizes = [1, 32], strides = [1, 1]} : vector<32x32xf32> to vector<1x32xf32>
    %c0_45 = arith.constant 0 : index
    %c768 = arith.constant 768 : index
    %75 = vector.load %arg13[%c0_45, %c768] : memref<2x1024xf32, #tpu.memory_space<vmem>>, vector<1x32xf32>
    tpu.vector_store %arg13[%c0_45, %c768], %74 {strides = array<i32>} : memref<2x1024xf32, #tpu.memory_space<vmem>>, vector<1x32xf32>,
    %76 = vector.extract_strided_slice %25 {offsets = [25, 0], sizes = [1, 32], strides = [1, 1]} : vector<32x32xf32> to vector<1x32xf32>
    %c0_46 = arith.constant 0 : index
    %c800 = arith.constant 800 : index
    %77 = vector.load %arg13[%c0_46, %c800] : memref<2x1024xf32, #tpu.memory_space<vmem>>, vector<1x32xf32>
    tpu.vector_store %arg13[%c0_46, %c800], %76 {strides = array<i32>} : memref<2x1024xf32, #tpu.memory_space<vmem>>, vector<1x32xf32>,
    %78 = vector.extract_strided_slice %25 {offsets = [26, 0], sizes = [1, 32], strides = [1, 1]} : vector<32x32xf32> to vector<1x32xf32>
    %c0_47 = arith.constant 0 : index
    %c832 = arith.constant 832 : index
    %79 = vector.load %arg13[%c0_47, %c832] : memref<2x1024xf32, #tpu.memory_space<vmem>>, vector<1x32xf32>
    tpu.vector_store %arg13[%c0_47, %c832], %78 {strides = array<i32>} : memref<2x1024xf32, #tpu.memory_space<vmem>>, vector<1x32xf32>,
    %80 = vector.extract_strided_slice %25 {offsets = [27, 0], sizes = [1, 32], strides = [1, 1]} : vector<32x32xf32> to vector<1x32xf32>
    %c0_48 = arith.constant 0 : index
    %c864 = arith.constant 864 : index
    %81 = vector.load %arg13[%c0_48, %c864] : memref<2x1024xf32, #tpu.memory_space<vmem>>, vector<1x32xf32>
    tpu.vector_store %arg13[%c0_48, %c864], %80 {strides = array<i32>} : memref<2x1024xf32, #tpu.memory_space<vmem>>, vector<1x32xf32>,
    %82 = vector.extract_strided_slice %25 {offsets = [28, 0], sizes = [1, 32], strides = [1, 1]} : vector<32x32xf32> to vector<1x32xf32>
    %c0_49 = arith.constant 0 : index
    %c896 = arith.constant 896 : index
    %83 = vector.load %arg13[%c0_49, %c896] : memref<2x1024xf32, #tpu.memory_space<vmem>>, vector<1x32xf32>
    tpu.vector_store %arg13[%c0_49, %c896], %82 {strides = array<i32>} : memref<2x1024xf32, #tpu.memory_space<vmem>>, vector<1x32xf32>,
    %84 = vector.extract_strided_slice %25 {offsets = [29, 0], sizes = [1, 32], strides = [1, 1]} : vector<32x32xf32> to vector<1x32xf32>
    %c0_50 = arith.constant 0 : index
    %c928 = arith.constant 928 : index
    %85 = vector.load %arg13[%c0_50, %c928] : memref<2x1024xf32, #tpu.memory_space<vmem>>, vector<1x32xf32>
    tpu.vector_store %arg13[%c0_50, %c928], %84 {strides = array<i32>} : memref<2x1024xf32, #tpu.memory_space<vmem>>, vector<1x32xf32>,
    %86 = vector.extract_strided_slice %25 {offsets = [30, 0], sizes = [1, 32], strides = [1, 1]} : vector<32x32xf32> to vector<1x32xf32>
    %c0_51 = arith.constant 0 : index
    %c960 = arith.constant 960 : index
    %87 = vector.load %arg13[%c0_51, %c960] : memref<2x1024xf32, #tpu.memory_space<vmem>>, vector<1x32xf32>
    tpu.vector_store %arg13[%c0_51, %c960], %86 {strides = array<i32>} : memref<2x1024xf32, #tpu.memory_space<vmem>>, vector<1x32xf32>,
    %88 = vector.extract_strided_slice %25 {offsets = [31, 0], sizes = [1, 32], strides = [1, 1]} : vector<32x32xf32> to vector<1x32xf32>
    %c0_52 = arith.constant 0 : index
    %c992 = arith.constant 992 : index
    %89 = vector.load %arg13[%c0_52, %c992] : memref<2x1024xf32, #tpu.memory_space<vmem>>, vector<1x32xf32>
    tpu.vector_store %arg13[%c0_52, %c992], %88 {strides = array<i32>} : memref<2x1024xf32, #tpu.memory_space<vmem>>, vector<1x32xf32>,
    %90 = vector.extract_strided_slice %6 {offsets = [8, 0], sizes = [8, 16], strides = [1, 1]} : vector<16x16xf32> to vector<8x16xf32>
    %cst_53 = arith.constant dense<0.000000e+00> : vector<16x32xf32>
    %91 = tpu.matmul %90, %7, %cst_53 {dimension_numbers = #tpu.dot_dimension_numbers<[0], [0], [1], [1], [0, 1, 1, 1], [], []>} : vector<8x16xf32>, vector<8x32xf32>, vector<16x32xf32> -> vector<16x32xf32>
    %92 = vector.broadcast %8 : vector<1x32xf32> to vector<16x32xf32>
    %93 = arith.addf %91, %92 : vector<16x32xf32>
    %94 = math.tanh %93 : vector<16x32xf32>
    %cst_54 = arith.constant dense<0.000000e+00> : vector<32x32xf32>
    %95 = tpu.matmul %94, %9, %cst_54 {dimension_numbers = #tpu.dot_dimension_numbers<[0], [0], [1], [1], [0, 1, 1, 1], [], []>} : vector<16x32xf32>, vector<16x32xf32>, vector<32x32xf32> -> vector<32x32xf32>
    %96 = vector.broadcast %10 : vector<1x32xf32> to vector<32x32xf32>
    %97 = arith.addf %95, %96 : vector<32x32xf32>
    %98 = math.tanh %97 : vector<32x32xf32>
    %cst_55 = arith.constant dense<0.000000e+00> : vector<32x32xf32>
    %99 = tpu.matmul %98, %11, %cst_55 {dimension_numbers = #tpu.dot_dimension_numbers<[0], [0], [1], [1], [0, 1, 1, 1], [], []>} : vector<32x32xf32>, vector<32x32xf32>, vector<32x32xf32> -> vector<32x32xf32>
    %100 = vector.broadcast %12 : vector<1x32xf32> to vector<32x32xf32>
    %101 = arith.addf %99, %100 : vector<32x32xf32>
    %102 = math.tanh %101 : vector<32x32xf32>
    %103 = vector.extract_strided_slice %102 {offsets = [0, 0], sizes = [1, 32], strides = [1, 1]} : vector<32x32xf32> to vector<1x32xf32>
    %c1 = arith.constant 1 : index
    %c0_56 = arith.constant 0 : index
    %104 = vector.load %arg13[%c1, %c0_56] : memref<2x1024xf32, #tpu.memory_space<vmem>>, vector<1x32xf32>
    tpu.vector_store %arg13[%c1, %c0_56], %103 {strides = array<i32>} : memref<2x1024xf32, #tpu.memory_space<vmem>>, vector<1x32xf32>,
    %105 = vector.extract_strided_slice %102 {offsets = [1, 0], sizes = [1, 32], strides = [1, 1]} : vector<32x32xf32> to vector<1x32xf32>
    %c1_57 = arith.constant 1 : index
    %c32_58 = arith.constant 32 : index
    %106 = vector.load %arg13[%c1_57, %c32_58] : memref<2x1024xf32, #tpu.memory_space<vmem>>, vector<1x32xf32>
    tpu.vector_store %arg13[%c1_57, %c32_58], %105 {strides = array<i32>} : memref<2x1024xf32, #tpu.memory_space<vmem>>, vector<1x32xf32>,
    %107 = vector.extract_strided_slice %102 {offsets = [2, 0], sizes = [1, 32], strides = [1, 1]} : vector<32x32xf32> to vector<1x32xf32>
    %c1_59 = arith.constant 1 : index
    %c64_60 = arith.constant 64 : index
    %108 = vector.load %arg13[%c1_59, %c64_60] : memref<2x1024xf32, #tpu.memory_space<vmem>>, vector<1x32xf32>
    tpu.vector_store %arg13[%c1_59, %c64_60], %107 {strides = array<i32>} : memref<2x1024xf32, #tpu.memory_space<vmem>>, vector<1x32xf32>,
    %109 = vector.extract_strided_slice %102 {offsets = [3, 0], sizes = [1, 32], strides = [1, 1]} : vector<32x32xf32> to vector<1x32xf32>
    %c1_61 = arith.constant 1 : index
    %c96_62 = arith.constant 96 : index
    %110 = vector.load %arg13[%c1_61, %c96_62] : memref<2x1024xf32, #tpu.memory_space<vmem>>, vector<1x32xf32>
    tpu.vector_store %arg13[%c1_61, %c96_62], %109 {strides = array<i32>} : memref<2x1024xf32, #tpu.memory_space<vmem>>, vector<1x32xf32>,
    %111 = vector.extract_strided_slice %102 {offsets = [4, 0], sizes = [1, 32], strides = [1, 1]} : vector<32x32xf32> to vector<1x32xf32>
    %c1_63 = arith.constant 1 : index
    %c128_64 = arith.constant 128 : index
    %112 = vector.load %arg13[%c1_63, %c128_64] : memref<2x1024xf32, #tpu.memory_space<vmem>>, vector<1x32xf32>
    tpu.vector_store %arg13[%c1_63, %c128_64], %111 {strides = array<i32>} : memref<2x1024xf32, #tpu.memory_space<vmem>>, vector<1x32xf32>,
    %113 = vector.extract_strided_slice %102 {offsets = [5, 0], sizes = [1, 32], strides = [1, 1]} : vector<32x32xf32> to vector<1x32xf32>
    %c1_65 = arith.constant 1 : index
    %c160_66 = arith.constant 160 : index
    %114 = vector.load %arg13[%c1_65, %c160_66] : memref<2x1024xf32, #tpu.memory_space<vmem>>, vector<1x32xf32>
    tpu.vector_store %arg13[%c1_65, %c160_66], %113 {strides = array<i32>} : memref<2x1024xf32, #tpu.memory_space<vmem>>, vector<1x32xf32>,
    %115 = vector.extract_strided_slice %102 {offsets = [6, 0], sizes = [1, 32], strides = [1, 1]} : vector<32x32xf32> to vector<1x32xf32>
    %c1_67 = arith.constant 1 : index
    %c192_68 = arith.constant 192 : index
    %116 = vector.load %arg13[%c1_67, %c192_68] : memref<2x1024xf32, #tpu.memory_space<vmem>>, vector<1x32xf32>
    tpu.vector_store %arg13[%c1_67, %c192_68], %115 {strides = array<i32>} : memref<2x1024xf32, #tpu.memory_space<vmem>>, vector<1x32xf32>,
    %117 = vector.extract_strided_slice %102 {offsets = [7, 0], sizes = [1, 32], strides = [1, 1]} : vector<32x32xf32> to vector<1x32xf32>
    %c1_69 = arith.constant 1 : index
    %c224_70 = arith.constant 224 : index
    %118 = vector.load %arg13[%c1_69, %c224_70] : memref<2x1024xf32, #tpu.memory_space<vmem>>, vector<1x32xf32>
    tpu.vector_store %arg13[%c1_69, %c224_70], %117 {strides = array<i32>} : memref<2x1024xf32, #tpu.memory_space<vmem>>, vector<1x32xf32>,
    %119 = vector.extract_strided_slice %102 {offsets = [8, 0], sizes = [1, 32], strides = [1, 1]} : vector<32x32xf32> to vector<1x32xf32>
    %c1_71 = arith.constant 1 : index
    %c256_72 = arith.constant 256 : index
    %120 = vector.load %arg13[%c1_71, %c256_72] : memref<2x1024xf32, #tpu.memory_space<vmem>>, vector<1x32xf32>
    tpu.vector_store %arg13[%c1_71, %c256_72], %119 {strides = array<i32>} : memref<2x1024xf32, #tpu.memory_space<vmem>>, vector<1x32xf32>,
    %121 = vector.extract_strided_slice %102 {offsets = [9, 0], sizes = [1, 32], strides = [1, 1]} : vector<32x32xf32> to vector<1x32xf32>
    %c1_73 = arith.constant 1 : index
    %c288_74 = arith.constant 288 : index
    %122 = vector.load %arg13[%c1_73, %c288_74] : memref<2x1024xf32, #tpu.memory_space<vmem>>, vector<1x32xf32>
    tpu.vector_store %arg13[%c1_73, %c288_74], %121 {strides = array<i32>} : memref<2x1024xf32, #tpu.memory_space<vmem>>, vector<1x32xf32>,
    %123 = vector.extract_strided_slice %102 {offsets = [10, 0], sizes = [1, 32], strides = [1, 1]} : vector<32x32xf32> to vector<1x32xf32>
    %c1_75 = arith.constant 1 : index
    %c320_76 = arith.constant 320 : index
    %124 = vector.load %arg13[%c1_75, %c320_76] : memref<2x1024xf32, #tpu.memory_space<vmem>>, vector<1x32xf32>
    tpu.vector_store %arg13[%c1_75, %c320_76], %123 {strides = array<i32>} : memref<2x1024xf32, #tpu.memory_space<vmem>>, vector<1x32xf32>,
    %125 = vector.extract_strided_slice %102 {offsets = [11, 0], sizes = [1, 32], strides = [1, 1]} : vector<32x32xf32> to vector<1x32xf32>
    %c1_77 = arith.constant 1 : index
    %c352_78 = arith.constant 352 : index
    %126 = vector.load %arg13[%c1_77, %c352_78] : memref<2x1024xf32, #tpu.memory_space<vmem>>, vector<1x32xf32>
    tpu.vector_store %arg13[%c1_77, %c352_78], %125 {strides = array<i32>} : memref<2x1024xf32, #tpu.memory_space<vmem>>, vector<1x32xf32>,
    %127 = vector.extract_strided_slice %102 {offsets = [12, 0], sizes = [1, 32], strides = [1, 1]} : vector<32x32xf32> to vector<1x32xf32>
    %c1_79 = arith.constant 1 : index
    %c384_80 = arith.constant 384 : index
    %128 = vector.load %arg13[%c1_79, %c384_80] : memref<2x1024xf32, #tpu.memory_space<vmem>>, vector<1x32xf32>
    tpu.vector_store %arg13[%c1_79, %c384_80], %127 {strides = array<i32>} : memref<2x1024xf32, #tpu.memory_space<vmem>>, vector<1x32xf32>,
    %129 = vector.extract_strided_slice %102 {offsets = [13, 0], sizes = [1, 32], strides = [1, 1]} : vector<32x32xf32> to vector<1x32xf32>
    %c1_81 = arith.constant 1 : index
    %c416_82 = arith.constant 416 : index
    %130 = vector.load %arg13[%c1_81, %c416_82] : memref<2x1024xf32, #tpu.memory_space<vmem>>, vector<1x32xf32>
    tpu.vector_store %arg13[%c1_81, %c416_82], %129 {strides = array<i32>} : memref<2x1024xf32, #tpu.memory_space<vmem>>, vector<1x32xf32>,
    %131 = vector.extract_strided_slice %102 {offsets = [14, 0], sizes = [1, 32], strides = [1, 1]} : vector<32x32xf32> to vector<1x32xf32>
    %c1_83 = arith.constant 1 : index
    %c448_84 = arith.constant 448 : index
    %132 = vector.load %arg13[%c1_83, %c448_84] : memref<2x1024xf32, #tpu.memory_space<vmem>>, vector<1x32xf32>
    tpu.vector_store %arg13[%c1_83, %c448_84], %131 {strides = array<i32>} : memref<2x1024xf32, #tpu.memory_space<vmem>>, vector<1x32xf32>,
    %133 = vector.extract_strided_slice %102 {offsets = [15, 0], sizes = [1, 32], strides = [1, 1]} : vector<32x32xf32> to vector<1x32xf32>
    %c1_85 = arith.constant 1 : index
    %c480_86 = arith.constant 480 : index
    %134 = vector.load %arg13[%c1_85, %c480_86] : memref<2x1024xf32, #tpu.memory_space<vmem>>, vector<1x32xf32>
    tpu.vector_store %arg13[%c1_85, %c480_86], %133 {strides = array<i32>} : memref<2x1024xf32, #tpu.memory_space<vmem>>, vector<1x32xf32>,
    %135 = vector.extract_strided_slice %102 {offsets = [16, 0], sizes = [1, 32], strides = [1, 1]} : vector<32x32xf32> to vector<1x32xf32>
    %c1_87 = arith.constant 1 : index
    %c512_88 = arith.constant 512 : index
    %136 = vector.load %arg13[%c1_87, %c512_88] : memref<2x1024xf32, #tpu.memory_space<vmem>>, vector<1x32xf32>
    tpu.vector_store %arg13[%c1_87, %c512_88], %135 {strides = array<i32>} : memref<2x1024xf32, #tpu.memory_space<vmem>>, vector<1x32xf32>,
    %137 = vector.extract_strided_slice %102 {offsets = [17, 0], sizes = [1, 32], strides = [1, 1]} : vector<32x32xf32> to vector<1x32xf32>
    %c1_89 = arith.constant 1 : index
    %c544_90 = arith.constant 544 : index
    %138 = vector.load %arg13[%c1_89, %c544_90] : memref<2x1024xf32, #tpu.memory_space<vmem>>, vector<1x32xf32>
    tpu.vector_store %arg13[%c1_89, %c544_90], %137 {strides = array<i32>} : memref<2x1024xf32, #tpu.memory_space<vmem>>, vector<1x32xf32>,
    %139 = vector.extract_strided_slice %102 {offsets = [18, 0], sizes = [1, 32], strides = [1, 1]} : vector<32x32xf32> to vector<1x32xf32>
    %c1_91 = arith.constant 1 : index
    %c576_92 = arith.constant 576 : index
    %140 = vector.load %arg13[%c1_91, %c576_92] : memref<2x1024xf32, #tpu.memory_space<vmem>>, vector<1x32xf32>
    tpu.vector_store %arg13[%c1_91, %c576_92], %139 {strides = array<i32>} : memref<2x1024xf32, #tpu.memory_space<vmem>>, vector<1x32xf32>,
    %141 = vector.extract_strided_slice %102 {offsets = [19, 0], sizes = [1, 32], strides = [1, 1]} : vector<32x32xf32> to vector<1x32xf32>
    %c1_93 = arith.constant 1 : index
    %c608_94 = arith.constant 608 : index
    %142 = vector.load %arg13[%c1_93, %c608_94] : memref<2x1024xf32, #tpu.memory_space<vmem>>, vector<1x32xf32>
    tpu.vector_store %arg13[%c1_93, %c608_94], %141 {strides = array<i32>} : memref<2x1024xf32, #tpu.memory_space<vmem>>, vector<1x32xf32>,
    %143 = vector.extract_strided_slice %102 {offsets = [20, 0], sizes = [1, 32], strides = [1, 1]} : vector<32x32xf32> to vector<1x32xf32>
    %c1_95 = arith.constant 1 : index
    %c640_96 = arith.constant 640 : index
    %144 = vector.load %arg13[%c1_95, %c640_96] : memref<2x1024xf32, #tpu.memory_space<vmem>>, vector<1x32xf32>
    tpu.vector_store %arg13[%c1_95, %c640_96], %143 {strides = array<i32>} : memref<2x1024xf32, #tpu.memory_space<vmem>>, vector<1x32xf32>,
    %145 = vector.extract_strided_slice %102 {offsets = [21, 0], sizes = [1, 32], strides = [1, 1]} : vector<32x32xf32> to vector<1x32xf32>
    %c1_97 = arith.constant 1 : index
    %c672_98 = arith.constant 672 : index
    %146 = vector.load %arg13[%c1_97, %c672_98] : memref<2x1024xf32, #tpu.memory_space<vmem>>, vector<1x32xf32>
    tpu.vector_store %arg13[%c1_97, %c672_98], %145 {strides = array<i32>} : memref<2x1024xf32, #tpu.memory_space<vmem>>, vector<1x32xf32>,
    %147 = vector.extract_strided_slice %102 {offsets = [22, 0], sizes = [1, 32], strides = [1, 1]} : vector<32x32xf32> to vector<1x32xf32>
    %c1_99 = arith.constant 1 : index
    %c704_100 = arith.constant 704 : index
    %148 = vector.load %arg13[%c1_99, %c704_100] : memref<2x1024xf32, #tpu.memory_space<vmem>>, vector<1x32xf32>
    tpu.vector_store %arg13[%c1_99, %c704_100], %147 {strides = array<i32>} : memref<2x1024xf32, #tpu.memory_space<vmem>>, vector<1x32xf32>,
    %149 = vector.extract_strided_slice %102 {offsets = [23, 0], sizes = [1, 32], strides = [1, 1]} : vector<32x32xf32> to vector<1x32xf32>
    %c1_101 = arith.constant 1 : index
    %c736_102 = arith.constant 736 : index
    %150 = vector.load %arg13[%c1_101, %c736_102] : memref<2x1024xf32, #tpu.memory_space<vmem>>, vector<1x32xf32>
    tpu.vector_store %arg13[%c1_101, %c736_102], %149 {strides = array<i32>} : memref<2x1024xf32, #tpu.memory_space<vmem>>, vector<1x32xf32>,
    %151 = vector.extract_strided_slice %102 {offsets = [24, 0], sizes = [1, 32], strides = [1, 1]} : vector<32x32xf32> to vector<1x32xf32>
    %c1_103 = arith.constant 1 : index
    %c768_104 = arith.constant 768 : index
    %152 = vector.load %arg13[%c1_103, %c768_104] : memref<2x1024xf32, #tpu.memory_space<vmem>>, vector<1x32xf32>
    tpu.vector_store %arg13[%c1_103, %c768_104], %151 {strides = array<i32>} : memref<2x1024xf32, #tpu.memory_space<vmem>>, vector<1x32xf32>,
    %153 = vector.extract_strided_slice %102 {offsets = [25, 0], sizes = [1, 32], strides = [1, 1]} : vector<32x32xf32> to vector<1x32xf32>
    %c1_105 = arith.constant 1 : index
    %c800_106 = arith.constant 800 : index
    %154 = vector.load %arg13[%c1_105, %c800_106] : memref<2x1024xf32, #tpu.memory_space<vmem>>, vector<1x32xf32>
    tpu.vector_store %arg13[%c1_105, %c800_106], %153 {strides = array<i32>} : memref<2x1024xf32, #tpu.memory_space<vmem>>, vector<1x32xf32>,
    %155 = vector.extract_strided_slice %102 {offsets = [26, 0], sizes = [1, 32], strides = [1, 1]} : vector<32x32xf32> to vector<1x32xf32>
    %c1_107 = arith.constant 1 : index
    %c832_108 = arith.constant 832 : index
    %156 = vector.load %arg13[%c1_107, %c832_108] : memref<2x1024xf32, #tpu.memory_space<vmem>>, vector<1x32xf32>
    tpu.vector_store %arg13[%c1_107, %c832_108], %155 {strides = array<i32>} : memref<2x1024xf32, #tpu.memory_space<vmem>>, vector<1x32xf32>,
    %157 = vector.extract_strided_slice %102 {offsets = [27, 0], sizes = [1, 32], strides = [1, 1]} : vector<32x32xf32> to vector<1x32xf32>
    %c1_109 = arith.constant 1 : index
    %c864_110 = arith.constant 864 : index
    %158 = vector.load %arg13[%c1_109, %c864_110] : memref<2x1024xf32, #tpu.memory_space<vmem>>, vector<1x32xf32>
    tpu.vector_store %arg13[%c1_109, %c864_110], %157 {strides = array<i32>} : memref<2x1024xf32, #tpu.memory_space<vmem>>, vector<1x32xf32>,
    %159 = vector.extract_strided_slice %102 {offsets = [28, 0], sizes = [1, 32], strides = [1, 1]} : vector<32x32xf32> to vector<1x32xf32>
    %c1_111 = arith.constant 1 : index
    %c896_112 = arith.constant 896 : index
    %160 = vector.load %arg13[%c1_111, %c896_112] : memref<2x1024xf32, #tpu.memory_space<vmem>>, vector<1x32xf32>
    tpu.vector_store %arg13[%c1_111, %c896_112], %159 {strides = array<i32>} : memref<2x1024xf32, #tpu.memory_space<vmem>>, vector<1x32xf32>,
    %161 = vector.extract_strided_slice %102 {offsets = [29, 0], sizes = [1, 32], strides = [1, 1]} : vector<32x32xf32> to vector<1x32xf32>
    %c1_113 = arith.constant 1 : index
    %c928_114 = arith.constant 928 : index
    %162 = vector.load %arg13[%c1_113, %c928_114] : memref<2x1024xf32, #tpu.memory_space<vmem>>, vector<1x32xf32>
    tpu.vector_store %arg13[%c1_113, %c928_114], %161 {strides = array<i32>} : memref<2x1024xf32, #tpu.memory_space<vmem>>, vector<1x32xf32>,
    %163 = vector.extract_strided_slice %102 {offsets = [30, 0], sizes = [1, 32], strides = [1, 1]} : vector<32x32xf32> to vector<1x32xf32>
    %c1_115 = arith.constant 1 : index
    %c960_116 = arith.constant 960 : index
    %164 = vector.load %arg13[%c1_115, %c960_116] : memref<2x1024xf32, #tpu.memory_space<vmem>>, vector<1x32xf32>
    tpu.vector_store %arg13[%c1_115, %c960_116], %163 {strides = array<i32>} : memref<2x1024xf32, #tpu.memory_space<vmem>>, vector<1x32xf32>,
    %165 = vector.extract_strided_slice %102 {offsets = [31, 0], sizes = [1, 32], strides = [1, 1]} : vector<32x32xf32> to vector<1x32xf32>
    %c1_117 = arith.constant 1 : index
    %c992_118 = arith.constant 992 : index
    %166 = vector.load %arg13[%c1_117, %c992_118] : memref<2x1024xf32, #tpu.memory_space<vmem>>, vector<1x32xf32>
    tpu.vector_store %arg13[%c1_117, %c992_118], %165 {strides = array<i32>} : memref<2x1024xf32, #tpu.memory_space<vmem>>, vector<1x32xf32>,
    %c0_119 = arith.constant 0 : index
    %c0_120 = arith.constant 0 : index
    %167 = vector.load %arg13[%c0_119, %c0_120] : memref<2x1024xf32, #tpu.memory_space<vmem>>, vector<2x1024xf32>
    %c0_121 = arith.constant 0 : index
    %c0_122 = arith.constant 0 : index
    %168 = vector.load %arg10[%c0_121, %c0_122] : memref<10x1024xf32, #tpu.memory_space<vmem>>, vector<10x1024xf32>
    %cst_123 = arith.constant dense<0.000000e+00> : vector<2x10xf32>
    %169 = tpu.matmul %167, %168, %cst_123 {dimension_numbers = #tpu.dot_dimension_numbers<[1], [1], [0], [0], [0, 0, 1, 0], [], []>} : vector<2x1024xf32>, vector<10x1024xf32>, vector<2x10xf32> -> vector<2x10xf32>
    %c0_124 = arith.constant 0 : index
    %c0_125 = arith.constant 0 : index
    %170 = vector.load %arg11[%c0_124, %c0_125] : memref<1x10xf32, #tpu.memory_space<vmem>>, vector<1x10xf32>
    %171 = vector.broadcast %170 : vector<1x10xf32> to vector<2x10xf32>
    %172 = arith.addf %169, %171 : vector<2x10xf32>
    %cst_126 = arith.constant dense<0xFF800000> : vector<2xf32>
    %173 = vector.multi_reduction <maximumf>, %172, %cst_126 [1] : vector<2x10xf32> to vector<2xf32>
    %174 = vector.shape_cast %173 : vector<2xf32> to vector<2x1xf32>
    %175 = vector.broadcast %174 : vector<2x1xf32> to vector<2x10xf32>
    %176 = arith.subf %172, %175 : vector<2x10xf32>
    %177 = math.exp %176 : vector<2x10xf32>
    %cst_127 = arith.constant dense<0.000000e+00> : vector<2xf32>
    %178 = vector.multi_reduction <add>, %177, %cst_127 [1] : vector<2x10xf32> to vector<2xf32>
    %179 = vector.shape_cast %178 : vector<2xf32> to vector<2x1xf32>
    %180 = math.log %179 : vector<2x1xf32>
    %181 = vector.broadcast %180 : vector<2x1xf32> to vector<2x10xf32>
    %182 = arith.subf %176, %181 : vector<2x10xf32>
    %c0_128 = arith.constant 0 : index
    %c0_129 = arith.constant 0 : index
    %183 = vector.load %arg12[%c0_128, %c0_129] : memref<2x10xf32, #tpu.memory_space<vmem>>, vector<2x10xf32>
    tpu.vector_store %arg12[%c0_128, %c0_129], %182 {strides = array<i32>} : memref<2x10xf32, #tpu.memory_space<vmem>>, vector<2x10xf32>,
    return
  }
  func.func @transform_0(%arg0: i32) -> (i32, i32) {
    %c0_i32 = arith.constant 0 : i32
    %c0_i32_0 = arith.constant 0 : i32
    %c0_i32_1 = arith.constant 0 : i32
    return %c0_i32, %c0_i32_0 : i32, i32
  }
  func.func @transform_1(%arg0: i32) -> (i32, i32) {
    %c0_i32 = arith.constant 0 : i32
    %c0_i32_0 = arith.constant 0 : i32
    %c0_i32_1 = arith.constant 0 : i32
    return %c0_i32, %c0_i32_0 : i32, i32
  }
  func.func @transform_2(%arg0: i32) -> (i32, i32) {
    %c0_i32 = arith.constant 0 : i32
    %c0_i32_0 = arith.constant 0 : i32
    %c0_i32_1 = arith.constant 0 : i32
    return %c0_i32, %c0_i32_0 : i32, i32
  }
  func.func @transform_3(%arg0: i32) -> (i32, i32) {
    %c0_i32 = arith.constant 0 : i32
    %c0_i32_0 = arith.constant 0 : i32
    %c0_i32_1 = arith.constant 0 : i32
    return %c0_i32, %c0_i32_0 : i32, i32
  }
  func.func @transform_4(%arg0: i32) -> (i32, i32) {
    %c0_i32 = arith.constant 0 : i32
    %c0_i32_0 = arith.constant 0 : i32
    %c0_i32_1 = arith.constant 0 : i32
    return %c0_i32, %c0_i32_0 : i32, i32
  }
  func.func @transform_5(%arg0: i32) -> (i32, i32) {
    %c0_i32 = arith.constant 0 : i32
    %c0_i32_0 = arith.constant 0 : i32
    %c0_i32_1 = arith.constant 0 : i32
    return %c0_i32, %c0_i32_0 : i32, i32
  }
  func.func @transform_6(%arg0: i32) -> (i32, i32) {
    %c0_i32 = arith.constant 0 : i32
    %c0_i32_0 = arith.constant 0 : i32
    %c0_i32_1 = arith.constant 0 : i32
    return %c0_i32, %c0_i32_0 : i32, i32
  }
  func.func @transform_7(%arg0: i32) -> (i32, i32) {
    %c0_i32 = arith.constant 0 : i32
    %c0_i32_0 = arith.constant 0 : i32
    %c0_i32_1 = arith.constant 0 : i32
    return %c0_i32, %c0_i32_0 : i32, i32
  }
  func.func @transform_8(%arg0: i32) -> (i32, i32) {
    %c0_i32 = arith.constant 0 : i32
    %c0_i32_0 = arith.constant 0 : i32
    %c0_i32_1 = arith.constant 0 : i32
    return %c0_i32, %c0_i32_0 : i32, i32
  }
  func.func @transform_9(%arg0: i32) -> (i32, i32) {
    %c0_i32 = arith.constant 0 : i32
    %c0_i32_0 = arith.constant 0 : i32
    %c0_i32_1 = arith.constant 0 : i32
    return %c0_i32, %c0_i32_0 : i32, i32
  }
  func.func @transform_10(%arg0: i32) -> (i32, i32) {
    %c0_i32 = arith.constant 0 : i32
    %c0_i32_0 = arith.constant 0 : i32
    %c0_i32_1 = arith.constant 0 : i32
    return %c0_i32, %c0_i32_0 : i32, i32
  }
  func.func @transform_11(%arg0: i32) -> (i32, i32) {
    %c0_i32 = arith.constant 0 : i32
    %c0_i32_0 = arith.constant 0 : i32
    %c0_i32_1 = arith.constant 0 : i32
    return %c0_i32, %c0_i32_0 : i32, i32
  }
}

</mosaic_0001>

<bundles_post_ra>
// kernel: tpu_custom_call.1
= control target key start
LH: loop header
LB: loop body
LE: loop exit
PB: predicated region body
PF: predicated region fallthrough
CT: control target
= control target key end

     0   :  { %16 = vsyncpa [#allocation4], 0  ;;  %s1913_s0 = inlined_call_operand.hbm [shape: f32[16,16], index: 0, kind: input, shape index: {}]   ;;  %s1914_s1 = inlined_call_operand.hbm [shape: f32[16,16], index: 1, kind: input, shape index: {}]   ;;  %s1915_s2 = inlined_call_operand.vmem [shape: f32[1,16], index: 2, kind: input, shape index: {}]   ;;  %s1916_s3 = inlined_call_operand.hbm [shape: f32[8,32], index: 3, kind: input, shape index: {}]   ;;  %s1917_s4 = inlined_call_operand.vmem [shape: f32[1,32], index: 4, kind: input, shape index: {}]   ;;  %s1918_s5 = inlined_call_operand.hbm [shape: f32[16,32], index: 5, kind: input, shape index: {}]   ;;  %s1919_s6 = inlined_call_operand.vmem [shape: f32[1,32], index: 6, kind: input, shape index: {}]   ;;  %s1920_s7 = inlined_call_operand.hbm [shape: f32[32,32], index: 7, kind: input, shape index: {}]   ;;  %s1921_s8 = inlined_call_operand.vmem [shape: f32[1,32], index: 8, kind: input, shape index: {}]   ;;  %s1922_s9 = inlined_call_operand.hbm [shape: f32[10,1024], index: 9, kind: input, shape index: {}]   ;;  %s1923_s10 = inlined_call_operand.vmem [shape: f32[1,10], index: 10, kind: input, shape index: {}]   ;;  %s1924_s11 = inlined_call_operand.hbm [shape: f32[2,10], index: 11, kind: output, shape index: {}]  }
   0x1   :  { %17 = vsyncpa [#allocation7], 0 }
   0x2   :  { %18 = vsyncpa [#allocation10], 0 }
   0x3   :  { %19 = vsyncpa [#allocation13], 0 }
   0x4   :  { %20 = vsyncpa [#allocation5], 0  ;;  %s38_s19 = sshll.u32 %s1914_s1, 4  ;;  %s1598_s20 = smov [#allocation6]   ;;  %s39_s19 = int_to_ptr.hbm [resolvable:$true] %s38_s19 }
   0x5   :  { %s40_s21 = sshll.u32 %s1598_s20, 4  ;;  %s66_s24 = sshll.u32 %s1918_s5, 4  ;;  %s41_s21 = int_to_ptr.vmem [resolvable:$true] %s40_s21  ;;  %s67_s24 = int_to_ptr.hbm [resolvable:$true] %s66_s24 }
   0x6   :  { %s1599_s25 = smov 128   ;;  %s1600_s26 = smov 8  }
   0x7   :  { %46 = dma.hbm_to_vmem [thread:$0]  %s39_s19, 256, %s41_s21, [#allocation7], %s1599_s25, %s1599_s25, %s1600_s26  }
   0x8   :  { %s1601_s27 = smov [#allocation9]   ;;  %s25_s1 = sshll.u32 %s1913_s0, 4  ;;  %s26_s1 = int_to_ptr.hbm [resolvable:$true] %s25_s1 }
   0x9   :  { %s68_s28 = sshll.u32 %s1601_s27, 4  ;;  %s54_s13 = sshll.u32 %s1916_s3, 4  ;;  %s69_s28 = int_to_ptr.vmem [resolvable:$true] %s68_s28  ;;  %s55_s13 = int_to_ptr.hbm [resolvable:$true] %s54_s13 }
   0xa   :  { %74 = dma.hbm_to_vmem [thread:$0]  %s67_s24, 256, %s69_s28, [#allocation10], %s1599_s25, %s1599_s25, %s1600_s26  }
   0xb   :  { %s1602_s14 = smov [#allocation3]   ;;  %s1603_s16 = smov [#allocation8]  }
   0xc   :  { %s27_s15 = sshll.u32 %s1602_s14, 4  ;;  %s56_s0 = sshll.u32 %s1603_s16, 4  ;;  %s28_s15 = int_to_ptr.vmem [resolvable:$true] %s27_s15  ;;  %s57_s0 = int_to_ptr.vmem [resolvable:$true] %s56_s0 }
   0xd   :  { %33 = dma.hbm_to_vmem [thread:$0]  %s26_s1, 256, %s28_s15, [#allocation4], %s1599_s25, %s1599_s25, %s1600_s26  }
   0xe   :  { %s81_s19 = sshll.u32 %s1920_s7, 4  ;;  %s96_s3 = sshll.u32 %s1922_s9, 4  ;;  %s82_s19 = int_to_ptr.hbm [resolvable:$true] %s81_s19  ;;  %s97_s3 = int_to_ptr.hbm [resolvable:$true] %s96_s3 }
   0xf   :  { %59 = dma.hbm_to_vmem [thread:$0]  %s55_s13, 128, %s57_s0, [#allocation7]  }
  0x10   :  { %s1604_s22 = smov [#allocation11]   ;;  %s1605_s24 = smov [#allocation12]  }
  0x11   :  { %s83_s23 = sshll.u32 %s1604_s22, 4  ;;  %s98_s27 = sshll.u32 %s1605_s24, 4  ;;  %s84_s23 = int_to_ptr.vmem [resolvable:$true] %s83_s23  ;;  %s99_s27 = int_to_ptr.vmem [resolvable:$true] %s98_s27 }
  0x12   :  { %89 = dma.hbm_to_vmem [thread:$0]  %s82_s19, 512, %s84_s23, [#allocation10], %s1599_s25, %s1599_s25, %s1600_s26  }
  0x13   :  { %s1606_s28 = smov 1024   ;;  %s1607_s7 = smov 64  }
  0x14   :  { %104 = dma.hbm_to_vmem [thread:$0]  %s97_s3, 2048, %s99_s27, [#allocation13], %s1606_s28, %s1606_s28, %s1607_s7  }
  0x15   :  { %1588 = dma.done.wait [#allocation4], 256  }
  0x16   :  { %1589 = vsyncadd [#allocation4], 4294967040 }
  0x17   :  { %1590 = dma.done.wait [#allocation7], 384  }
  0x18   :  { %1591 = vsyncadd [#allocation7], 4294966912 }
  0x19   :  { %1592 = dma.done.wait [#allocation10], 768  }
  0x1a   :  { %1593 = vsyncadd [#allocation10], 4294966528 }
  0x1b   :  { %1594 = dma.done.wait [#allocation13], 2048  }
  0x1c   :  { %1595 = vsyncadd [#allocation13], 4294965248  ;;  %v134_v0 = vld [vmem:[#allocation6 + $0x8] sm:$0xff]  ;;  %v133_v1 = vld [vmem:[#allocation6] sm:$0xff]  ;;  %vm139_vm0 = vcmask 130048   ;;  %vm216_vm1 = vcmask 64512  }
  0x1d   :  { %160 = vmatpush.msra.mxu0 %v134_v0  ;;  %v131_v2 = vld [vmem:[#allocation3] sm:$0xff]  ;;  %v132_v3 = vld [vmem:[#allocation3 + $0x8] sm:$0xff]  ;;  %v174_v19 = vld [vmem:[#allocation9 + $0x8] sm:$0xff]  ;;  %vm363_vm2 = vcmask 261120   ;;  %vm409_vm3 = vcmask 253952   ;;  %s1608_s1 = smov 32  }
  0x1e   :  { %v171_v4 = vld [vmem:[#allocation8] sm:$0xff]  ;;  %v1367_v5 = vld [vmem:[%s1915_s2] ss:$0 sm:$0xff]  ;;  %309 = vmatpush.msra.mxu2 %v174_v19  ;;  %v179_v44 = vld [vmem:[#allocation11 + $0x18] sm:$0xff]  ;;  %vm417_vm4 = vcmask 516352   ;;  %vm425_vm5 = vcmask 778752  }
  0x1f   :  { %161 = vmatpush.msra.mxu0 %v133_v1  ;;  %238 = vmatpush.msra.mxu1 %v171_v4  ;;  %v1368_v16 = vld [vmem:[%s1917_s4] ss:$0 sm:$0xff]  ;;  %v177_v46 = vld [vmem:[#allocation11 + $0x8] sm:$0xff]  ;;  %v176_v47 = vld [vmem:[#allocation11] sm:$0xff]  ;;  %vm435_vm6 = vcmask 1041152   ;;  %vm1265_vm7 = vcmask 74752  }
  0x20   :  { %1299 = vmatmul.msk.f32.vlgmr.msra.gmra.mxu0 %vm139_vm0, %v131_v2  ;;  %v173_v20 = vld [vmem:[#allocation9] sm:$0xff]  ;;  %388 = vmatpush.msra.mxu3 %v179_v44  ;;  %s1286_s16 = sshll.u32 %s1924_s11, 4  ;;  %s1287_s16 = int_to_ptr.hbm [resolvable:$true] %s1286_s16 }
  0x21   :  { %682 = vmatpush.msrb.mxu1 %v171_v4  ;;  %750 = vmatpush.msrb.mxu0 %v174_v19  ;;  %v1369_v39 = vld [vmem:[%s1919_s6] ss:$0 sm:$0xff] }
  0x22   :  { %310 = vmatpush.msra.mxu2 %v173_v20  ;;  %v178_v45 = vld [vmem:[#allocation11 + $0x10] sm:$0xff] }
  0x23   :  { %751 = vmatpush.msrb.mxu0 %v173_v20  ;;  %389 = vmatpush.msra.mxu3 %v178_v45 }
  0x25   :  { %390 = vmatpush.msra.mxu3 %v177_v46 }
  0x27   :  { %391 = vmatpush.msra.mxu3 %v176_v47 }
  0x28   :  { %1300 = vmatmul.msk.f32.gmra.mxu0 %vm139_vm0, %v132_v3 }
  0x9d   :  { %v163_v6 = vpop.f32.mrf.mxu0 }
  0x9e   :  { %v164_v7 = vadd.f32 %v1367_v5, %v163_v6 }
  0xa0   :  { %1372 = vtanh.f32 %v164_v7 }
  0xa5   :  { %v166_v8 = vpop.f32.mrf.mxu0 }
  0xa6   :  { %v1373_v9 = vpop.eup %1372  ;;  %v167_v10 = vadd.f32 %v1367_v5, %v166_v8 }
  0xa7   :  { %184 = vxpose.xlu0.b32.start.end [1/1] (short) (narrow) %v1373_v9, 16 }
  0xa8   :  { %1374 = vtanh.f32 %v167_v10 }
  0xae   :  { %v1375_v11 = vpop.eup %1374 }
  0xaf   :  { %629 = vxpose.xlu1.b32.start.end [1/1] (short) (narrow) %v1375_v11, 16 }
 0x14b   :  { %v200_v12 = vpop.trf.xlu0 }
 0x14c   :  { %1301 = vmatmul.msk.f32.vlgmr.msra.gmra.mxu1 %vm216_vm1, %v200_v12  ;;  %v1370_v12 = vld [vmem:[%s1921_s8] ss:$0 sm:$0xff]  ;;  %s1609_s8 = smov 96  }
 0x14d   :  { %825 = vmatpush.msra.mxu1 %v179_v44 }
 0x14f   :  { %826 = vmatpush.msra.mxu1 %v178_v45 }
 0x151   :  { %827 = vmatpush.msra.mxu1 %v177_v46 }
 0x153   :  { %v201_v13 = vpop.trf.xlu0  ;;  %v645_v14 = vpop.trf.xlu1  ;;  %828 = vmatpush.msra.mxu1 %v176_v47 }
 0x154   :  { %1302 = vmatmul.msk.f32.gmra.mxu1 %vm216_vm1, %v201_v13 }
 0x15b   :  { %v646_v15 = vpop.trf.xlu1 }
 0x15c   :  { %1327 = vmatmul.msk.f32.vlgmr.msrb.gmra.mxu1 %vm216_vm1, %v645_v14 }
 0x164   :  { %1328 = vmatmul.msk.f32.gmra.mxu1 %vm216_vm1, %v646_v15 }
 0x1c9   :  { %v240_v17 = vpop.f32.mrf.mxu1 }
 0x1ca   :  { %v241_v18 = vadd.f32 %v1368_v16, %v240_v17 }
 0x1cc   :  { %1376 = vtanh.f32 %v241_v18 }
 0x1d1   :  { %v243_v21 = vpop.f32.mrf.mxu1 }
 0x1d2   :  { %v1377_v22 = vpop.eup %1376  ;;  %v244_v23 = vadd.f32 %v1368_v16, %v243_v21 }
 0x1d3   :  { %251 = vxpose.xlu0.b32.start [1/2] (short) (narrow) %v1377_v22, 32 }
 0x1d4   :  { %1378 = vtanh.f32 %v244_v23 }
 0x1d9   :  { %v684_v24 = vpop.f32.mrf.mxu1 }
 0x1da   :  { %v1379_v25 = vpop.eup %1378  ;;  %v685_v26 = vadd.f32 %v1368_v16, %v684_v24 }
 0x1db   :  { %252 = vxpose.xlu0.b32.end [2/2] (short) (narrow) %v1379_v25, 32 }
 0x1dc   :  { %1380 = vtanh.f32 %v685_v26 }
 0x1e1   :  { %v687_v27 = vpop.f32.mrf.mxu1 }
 0x1e2   :  { %v1381_v28 = vpop.eup %1380  ;;  %v688_v29 = vadd.f32 %v1368_v16, %v687_v27 }
 0x1e3   :  { %692 = vxpose.xlu2.b32.start [1/2] (short) (narrow) %v1381_v28, 32 }
 0x1e4   :  { %1382 = vtanh.f32 %v688_v29 }
 0x1ea   :  { %v1383_v30 = vpop.eup %1382 }
 0x1eb   :  { %693 = vxpose.xlu2.b32.end [2/2] (short) (narrow) %v1383_v30, 32 }
 0x277   :  { %v267_v31 = vpop.trf.xlu0 }
 0x278   :  { %1303 = vmatmul.msk.f32.vlgmr.msra.gmra.mxu2 %vm139_vm0, %v267_v31 }
 0x27c   :  { %v708_v32 = vpop.trf.xlu2 }
 0x27d   :  { %1329 = vmatmul.msk.f32.vlgmr.msrb.gmra.mxu0 %vm139_vm0, %v708_v32 }
 0x27f   :  { %v268_v33 = vpop.trf.xlu0 }
 0x280   :  { %1304 = vmatmul.msk.f32.gmra.mxu2 %vm139_vm0, %v268_v33 }
 0x284   :  { %v709_v34 = vpop.trf.xlu2 }
 0x285   :  { %1330 = vmatmul.msk.f32.gmra.mxu0 %vm139_vm0, %v709_v34 }
 0x287   :  { %v269_v35 = vpop.trf.xlu0 }
 0x288   :  { %1305 = vmatmul.msk.f32.gmra.mxu2 %vm139_vm0, %v269_v35 }
 0x28c   :  { %v710_v36 = vpop.trf.xlu2 }
 0x28d   :  { %1331 = vmatmul.msk.f32.gmra.mxu0 %vm139_vm0, %v710_v36 }
 0x28f   :  { %v270_v37 = vpop.trf.xlu0 }
 0x290   :  { %1306 = vmatmul.msk.f32.gmra.mxu2 %vm139_vm0, %v270_v37 }
 0x294   :  { %v711_v38 = vpop.trf.xlu2 }
 0x295   :  { %1332 = vmatmul.msk.f32.gmra.mxu0 %vm139_vm0, %v711_v38 }
 0x2fa   :  { %v753_v40 = vpop.f32.mrf.mxu0 }
 0x2fb   :  { %v312_v41 = vpop.f32.mrf.mxu2  ;;  %v754_v42 = vadd.f32 %v1369_v39, %v753_v40 }
 0x2fc   :  { %v313_v43 = vadd.f32 %v1369_v39, %v312_v41 }
 0x2fd   :  { %1384 = vtanh.f32 %v754_v42 }
 0x2fe   :  { %1386 = vtanh.f32 %v313_v43 }
 0x302   :  { %v756_v48 = vpop.f32.mrf.mxu0 }
 0x303   :  { %v1385_v49 = vpop.eup %1384  ;;  %v315_v50 = vpop.f32.mrf.mxu2  ;;  %v757_v51 = vadd.f32 %v1369_v39, %v756_v48 }
 0x304   :  { %v1387_v52 = vpop.eup %1386  ;;  %v316_v53 = vadd.f32 %v1369_v39, %v315_v50  ;;  %769 = vxpose.xlu2.b32.start [1/4] (short) (narrow) %v1385_v49, 32 }
 0x305   :  { %331 = vxpose.xlu1.b32.start [1/4] (short) (narrow) %v1387_v52, 32  ;;  %1388 = vtanh.f32 %v757_v51 }
 0x306   :  { %1390 = vtanh.f32 %v316_v53 }
 0x30a   :  { %v759_v54 = vpop.f32.mrf.mxu0 }
 0x30b   :  { %v1389_v55 = vpop.eup %1388  ;;  %v318_v56 = vpop.f32.mrf.mxu2  ;;  %v760_v57 = vadd.f32 %v1369_v39, %v759_v54 }
 0x30c   :  { %v1391_v58 = vpop.eup %1390  ;;  %v319_v59 = vadd.f32 %v1369_v39, %v318_v56  ;;  %770 = vxpose.xlu2.b32.cont [2/4] (short) (narrow) %v1389_v55, 32 }
 0x30d   :  { %332 = vxpose.xlu1.b32.cont [2/4] (short) (narrow) %v1391_v58, 32  ;;  %1392 = vtanh.f32 %v760_v57 }
 0x30e   :  { %1394 = vtanh.f32 %v319_v59 }
 0x312   :  { %v762_v60 = vpop.f32.mrf.mxu0 }
 0x313   :  { %v1393_v61 = vpop.eup %1392  ;;  %v321_v62 = vpop.f32.mrf.mxu2  ;;  %v763_v63 = vadd.f32 %v1369_v39, %v762_v60 }
 0x314   :  { %v1395_v0 = vpop.eup %1394  ;;  %v322_v1 = vadd.f32 %v1369_v39, %v321_v62  ;;  %771 = vxpose.xlu2.b32.cont [3/4] (short) (narrow) %v1393_v61, 32 }
 0x315   :  { %333 = vxpose.xlu1.b32.cont [3/4] (short) (narrow) %v1395_v0, 32  ;;  %1396 = vtanh.f32 %v763_v63 }
 0x316   :  { %1398 = vtanh.f32 %v322_v1 }
 0x31b   :  { %v1397_v2 = vpop.eup %1396 }
 0x31c   :  { %v1399_v3 = vpop.eup %1398  ;;  %772 = vxpose.xlu2.b32.end [4/4] (short) (narrow) %v1397_v2, 32 }
 0x31d   :  { %334 = vxpose.xlu1.b32.end [4/4] (short) (narrow) %v1399_v3, 32 }
 0x39d   :  { %v785_v4 = vpop.trf.xlu2 }
 0x39e   :  { %1333 = vmatmul.msk.f32.vlgmr.msra.gmra.mxu1 %vm363_vm2, %v785_v4 }
 0x3a5   :  { %v786_v5 = vpop.trf.xlu2 }
 0x3a6   :  { %1334 = vmatmul.msk.f32.gmra.mxu1 %vm363_vm2, %v786_v5 }
 0x3a9   :  { %v347_v6 = vpop.trf.xlu1 }
 0x3aa   :  { %1307 = vmatmul.msk.f32.vlgmr.msra.gmra.mxu3 %vm363_vm2, %v347_v6 }
 0x3ad   :  { %v787_v7 = vpop.trf.xlu2 }
 0x3ae   :  { %1335 = vmatmul.msk.f32.gmra.mxu1 %vm363_vm2, %v787_v7 }
 0x3b1   :  { %v348_v8 = vpop.trf.xlu1 }
 0x3b2   :  { %1308 = vmatmul.msk.f32.gmra.mxu3 %vm363_vm2, %v348_v8 }
 0x3b5   :  { %v788_v9 = vpop.trf.xlu2 }
 0x3b6   :  { %1336 = vmatmul.msk.f32.gmra.mxu1 %vm363_vm2, %v788_v9 }
 0x3b9   :  { %v349_v10 = vpop.trf.xlu1 }
 0x3ba   :  { %1309 = vmatmul.msk.f32.gmra.mxu3 %vm363_vm2, %v349_v10 }
 0x3c1   :  { %v350_v11 = vpop.trf.xlu1 }
 0x3c2   :  { %1310 = vmatmul.msk.f32.gmra.mxu3 %vm363_vm2, %v350_v11 }
 0x41b   :  { %v830_v13 = vpop.f32.mrf.mxu1 }
 0x41c   :  { %v831_v14 = vadd.f32 %v1370_v12, %v830_v13 }
 0x41e   :  { %1400 = vtanh.f32 %v831_v14 }
 0x423   :  { %v833_v15 = vpop.f32.mrf.mxu1 }
 0x424   :  { %v1732_v16 = vpop.eup %1400  ;;  %v834_v22 = vadd.f32 %v1370_v12, %v833_v15 }
 0x425   :  { %v1337_v17 = vrot.slane %v1732_v16, 9  ;;  %846 = vst.msk [vmem:[#allocation2 + $0x1] sm:$0x1] %vm409_vm3, %v1732_v16 }
 0x427   :  { %850 = vrot.lane.b32.xlu1 %v1337_v17, %s1608_s1 }
 0x42b   :  { %v836_v18 = vpop.f32.mrf.mxu1 }
 0x42c   :  { %v837_v19 = vadd.f32 %v1370_v12, %v836_v18 }
 0x42d   :  { %v393_v20 = vpop.f32.mrf.mxu3 }
 0x42e   :  { %v394_v21 = vadd.f32 %v1370_v12, %v393_v20  ;;  %1402 = vtanh.f32 %v837_v19 }
 0x430   :  { %1404 = vtanh.f32 %v394_v21 }
 0x431   :  { %1406 = vtanh.f32 %v834_v22 }
 0x433   :  { %v839_v23 = vpop.f32.mrf.mxu1 }
 0x434   :  { %v1738_v24 = vpop.eup %1402  ;;  %v840_v25 = vadd.f32 %v1370_v12, %v839_v23 }
 0x435   :  { %v396_v26 = vpop.f32.mrf.mxu3  ;;  %954 = vst.msk [vmem:[#allocation2 + $0x9] sm:$0x1] %vm409_vm3, %v1738_v24  ;;  %v1345_v44 = vrot.slane %v1738_v24, 9 }
 0x436   :  { %v1405_v27 = vpop.eup %1404  ;;  %v397_v28 = vadd.f32 %v1370_v12, %v396_v26  ;;  %1408 = vtanh.f32 %v840_v25 }
 0x437   :  { %419 = vst.sshfl [vmem:[#allocation1] sm:$0xff pattern:$0x73625140] %v1405_v27  ;;  %v1311_v29 = vrot.slane %v1405_v27, 9  ;;  %v1742_v30 = vpop.eup %1406 }
 0x438   :  { %1410 = vtanh.f32 %v397_v28  ;;  %410 = vst.msk [vmem:[#allocation2] sm:$0x1] %vm409_vm3, %v1405_v27  ;;  %v1341_v41 = vrot.slane %v1742_v30, 9 }
 0x439   :  { %414 = vrot.lane.b32.xlu0 %v1311_v29, %s1608_s1  ;;  %900 = vst.msk [vmem:[#allocation2 + $0x5] sm:$0x1] %vm409_vm3, %v1742_v30 }
 0x43c   :  { %v1748_v31 = vpop.eup %1408 }
 0x43d   :  { %v399_v32 = vpop.f32.mrf.mxu3  ;;  %1008 = vst.msk [vmem:[#allocation2 + $0xd] sm:$0x1] %vm409_vm3, %v1748_v31  ;;  %v1349_v45 = vrot.slane %v1748_v31, 9 }
 0x43e   :  { %v1411_v33 = vpop.eup %1410  ;;  %v421_v34 = vld [vmem:[#allocation1 + $0x1] ss:$4 sm:$0xff]  ;;  %v400_v35 = vadd.f32 %v1370_v12, %v399_v32 }
 0x43f   :  { %427 = vst.sshfl [vmem:[#allocation1] sm:$0xff pattern:$0x73625140] %v1405_v27  ;;  %v1315_v36 = vrot.slane %v1411_v33, 9 }
 0x440   :  { %1412 = vtanh.f32 %v400_v35  ;;  %467 = vst.msk [vmem:[#allocation2 + $0x4] sm:$0x1] %vm409_vm3, %v1411_v33 }
 0x441   :  { %422 = vrot.lane.b32.xlu0 %v421_v34, %s1607_s7  ;;  %471 = vrot.lane.b32.xlu2 %v1315_v36, %s1608_s1 }
 0x445   :  { %v402_v37 = vpop.f32.mrf.mxu3 }
 0x446   :  { %v1755_v38 = vpop.eup %1412  ;;  %v429_v39 = vld [vmem:[#allocation1 + $0x1] ss:$4 sm:$0xff]  ;;  %v403_v40 = vadd.f32 %v1370_v12, %v402_v37 }
 0x447   :  { %437 = vst.sshfl [vmem:[#allocation1] sm:$0xff pattern:$0x73625140] %v1405_v27  ;;  %v1312_v42 = vrot.slane %v429_v39, 9  ;;  %v1319_v43 = vrot.slane %v1755_v38, 9 }
 0x448   :  { %1414 = vtanh.f32 %v403_v40  ;;  %521 = vst.msk [vmem:[#allocation2 + $0x8] sm:$0x1] %vm409_vm3, %v1755_v38 }
 0x449   :  { %432 = vrot.lane.b32.xlu1 %v1312_v42, %s1609_s8  ;;  %525 = vrot.lane.b32.xlu2 %v1319_v43, %s1608_s1 }
 0x44a   :  { %904 = vrot.lane.b32.xlu0 %v1341_v41, %s1608_s1 }
 0x44e   :  { %v1766_v46 = vpop.eup %1414  ;;  %v439_v47 = vld [vmem:[#allocation1 + $0x2] ss:$4 sm:$0xff] }
 0x44f   :  { %442 = vst.sshfl [vmem:[#allocation1] sm:$0xff pattern:$0x73625140] %v1405_v27  ;;  %v1323_v48 = vrot.slane %v1766_v46, 9 }
 0x450   :  { %441 = vst.msk [vmem:[#allocation2 + $0x2] sm:$0x1] %vm409_vm3, %v439_v47 }
 0x451   :  { %958 = vrot.lane.b32.xlu1 %v1345_v44, %s1608_s1  ;;  %1012 = vrot.lane.b32.xlu2 %v1349_v45, %s1608_s1  ;;  %575 = vst.msk [vmem:[#allocation2 + $0xc] sm:$0x1] %vm409_vm3, %v1766_v46 }
 0x452   :  { %579 = vrot.lane.b32.xlu0 %v1323_v48, %s1608_s1 }
 0x456   :  { %v444_v49 = vld [vmem:[#allocation1 + $0x2] ss:$4 sm:$0xff] }
 0x457   :  { %451 = vst.sshfl [vmem:[#allocation1] sm:$0xff pattern:$0x73625140] %v1405_v27  ;;  %v1313_v50 = vrot.slane %v444_v49, 9 }
 0x459   :  { %447 = vrot.lane.b32.xlu1 %v1313_v50, %s1608_s1 }
 0x45e   :  { %v453_v51 = vld [vmem:[#allocation1 + $0x3] ss:$4 sm:$0xff] }
 0x45f   :  { %458 = vst.sshfl [vmem:[#allocation1] sm:$0xff pattern:$0x73625140] %v1405_v27  ;;  %454 = vrot.lane.b32.xlu2 %v453_v51, %s1607_s7 }
 0x466   :  { %v460_v52 = vld [vmem:[#allocation1 + $0x3] ss:$4 sm:$0xff] }
 0x467   :  { %475 = vst.sshfl [vmem:[#allocation1] sm:$0xff pattern:$0x73625140] %v1411_v33  ;;  %v1314_v53 = vrot.slane %v460_v52, 9 }
 0x469   :  { %463 = vrot.lane.b32.xlu0 %v1314_v53, %s1609_s8 }
 0x46e   :  { %v477_v54 = vld [vmem:[#allocation1 + $0x1] ss:$4 sm:$0xff] }
 0x46f   :  { %482 = vst.sshfl [vmem:[#allocation1] sm:$0xff pattern:$0x73625140] %v1411_v33  ;;  %478 = vrot.lane.b32.xlu1 %v477_v54, %s1607_s7 }
 0x476   :  { %v484_v55 = vld [vmem:[#allocation1 + $0x1] ss:$4 sm:$0xff] }
 0x477   :  { %491 = vst.sshfl [vmem:[#allocation1] sm:$0xff pattern:$0x73625140] %v1411_v33  ;;  %v1316_v56 = vrot.slane %v484_v55, 9 }
 0x479   :  { %487 = vrot.lane.b32.xlu2 %v1316_v56, %s1609_s8 }
 0x47e   :  { %v493_v57 = vld [vmem:[#allocation1 + $0x2] ss:$4 sm:$0xff] }
 0x47f   :  { %496 = vst.sshfl [vmem:[#allocation1] sm:$0xff pattern:$0x73625140] %v1411_v33 }
 0x480   :  { %495 = vst.msk [vmem:[#allocation2 + $0x6] sm:$0x1] %vm409_vm3, %v493_v57 }
 0x486   :  { %v498_v58 = vld [vmem:[#allocation1 + $0x2] ss:$4 sm:$0xff] }
 0x487   :  { %505 = vst.sshfl [vmem:[#allocation1] sm:$0xff pattern:$0x73625140] %v1411_v33  ;;  %v1317_v59 = vrot.slane %v498_v58, 9 }
 0x489   :  { %501 = vrot.lane.b32.xlu1 %v1317_v59, %s1608_s1 }
 0x48e   :  { %v507_v60 = vld [vmem:[#allocation1 + $0x3] ss:$4 sm:$0xff] }
 0x48f   :  { %512 = vst.sshfl [vmem:[#allocation1] sm:$0xff pattern:$0x73625140] %v1411_v33  ;;  %508 = vrot.lane.b32.xlu0 %v507_v60, %s1607_s7 }
 0x496   :  { %v514_v61 = vld [vmem:[#allocation1 + $0x3] ss:$4 sm:$0xff] }
 0x497   :  { %v1318_v62 = vrot.slane %v514_v61, 9  ;;  %529 = vst.sshfl [vmem:[#allocation1] sm:$0xff pattern:$0x73625140] %v1755_v38 }
 0x499   :  { %517 = vrot.lane.b32.xlu1 %v1318_v62, %s1609_s8  ;;  %v851_v63 = vpop.permute.xlu1 %850 }
 0x49a   :  { %853 = vst.msk [vmem:[#allocation2 + $0x1] sm:$0x1] %vm417_vm4, %v851_v63 }
 0x49b   :  { %v472_v0 = vpop.permute.xlu2 %471 }
 0x49c   :  { %474 = vst.msk [vmem:[#allocation2 + $0x4] sm:$0x1] %vm417_vm4, %v472_v0 }
 0x49e   :  { %v531_v1 = vld [vmem:[#allocation1 + $0x1] ss:$4 sm:$0xff] }
 0x49f   :  { %532 = vrot.lane.b32.xlu0 %v531_v1, %s1607_s7  ;;  %536 = vst.sshfl [vmem:[#allocation1] sm:$0xff pattern:$0x73625140] %v1755_v38 }
 0x4a3   :  { %v526_v2 = vpop.permute.xlu2 %525 }
 0x4a4   :  { %528 = vst.msk [vmem:[#allocation2 + $0x8] sm:$0x1] %vm417_vm4, %v526_v2 }
 0x4a6   :  { %v538_v3 = vld [vmem:[#allocation1 + $0x1] ss:$4 sm:$0xff] }
 0x4a7   :  { %v1320_v4 = vrot.slane %v538_v3, 9  ;;  %545 = vst.sshfl [vmem:[#allocation1] sm:$0xff pattern:$0x73625140] %v1755_v38 }
 0x4a9   :  { %541 = vrot.lane.b32.xlu1 %v1320_v4, %s1609_s8 }
 0x4ab   :  { %v415_v5 = vpop.permute.xlu0 %414  ;;  %v1013_v6 = vpop.permute.xlu2 %1012 }
 0x4ac   :  { %418 = vst.msk [vmem:[#allocation2] sm:$0x1] %vm417_vm4, %v415_v5 }
 0x4ad   :  { %1015 = vst.msk [vmem:[#allocation2 + $0xd] sm:$0x1] %vm417_vm4, %v1013_v6 }
 0x4ae   :  { %v547_v7 = vld [vmem:[#allocation1 + $0x2] ss:$4 sm:$0xff] }
 0x4af   :  { %550 = vst.sshfl [vmem:[#allocation1] sm:$0xff pattern:$0x73625140] %v1755_v38 }
 0x4b0   :  { %549 = vst.msk [vmem:[#allocation2 + $0xa] sm:$0x1] %vm409_vm3, %v547_v7 }
 0x4b3   :  { %v423_v8 = vpop.permute.xlu0 %422 }
 0x4b4   :  { %426 = vst.msk [vmem:[#allocation2] sm:$0x1] %vm425_vm5, %v423_v8 }
 0x4b6   :  { %v552_v9 = vld [vmem:[#allocation1 + $0x2] ss:$4 sm:$0xff] }
 0x4b7   :  { %v1321_v10 = vrot.slane %v552_v9, 9  ;;  %559 = vst.sshfl [vmem:[#allocation1] sm:$0xff pattern:$0x73625140] %v1755_v38 }
 0x4b9   :  { %555 = vrot.lane.b32.xlu1 %v1321_v10, %s1608_s1  ;;  %v455_v20 = vpop.permute.xlu2 %454 }
 0x4bb   :  { %v433_v11 = vpop.permute.xlu1 %432 }
 0x4bc   :  { %436 = vst.msk [vmem:[#allocation2] sm:$0x1] %vm435_vm6, %v433_v11  ;;  %v905_v12 = vpop.permute.xlu0 %904 }
 0x4bd   :  { %907 = vst.msk [vmem:[#allocation2 + $0x5] sm:$0x1] %vm417_vm4, %v905_v12 }
 0x4be   :  { %v561_v13 = vld [vmem:[#allocation1 + $0x3] ss:$4 sm:$0xff] }
 0x4bf   :  { %562 = vrot.lane.b32.xlu2 %v561_v13, %s1607_s7  ;;  %566 = vst.sshfl [vmem:[#allocation1] sm:$0xff pattern:$0x73625140] %v1755_v38 }
 0x4c3   :  { %v959_v14 = vpop.permute.xlu1 %958 }
 0x4c4   :  { %961 = vst.msk [vmem:[#allocation2 + $0x9] sm:$0x1] %vm417_vm4, %v959_v14  ;;  %v580_v15 = vpop.permute.xlu0 %579 }
 0x4c5   :  { %582 = vst.msk [vmem:[#allocation2 + $0xc] sm:$0x1] %vm417_vm4, %v580_v15 }
 0x4c6   :  { %v568_v17 = vld [vmem:[#allocation1 + $0x3] ss:$4 sm:$0xff] }
 0x4c7   :  { %v1322_v18 = vrot.slane %v568_v17, 9  ;;  %583 = vst.sshfl [vmem:[#allocation1] sm:$0xff pattern:$0x73625140] %v1766_v46 }
 0x4c9   :  { %571 = vrot.lane.b32.xlu0 %v1322_v18, %s1609_s8 }
 0x4cb   :  { %v448_v19 = vpop.permute.xlu1 %447 }
 0x4cc   :  { %450 = vst.msk [vmem:[#allocation2 + $0x2] sm:$0x1] %vm417_vm4, %v448_v19 }
 0x4cd   :  { %457 = vst.msk [vmem:[#allocation2 + $0x2] sm:$0x1] %vm425_vm5, %v455_v20 }
 0x4ce   :  { %v585_v21 = vld [vmem:[#allocation1 + $0x1] ss:$4 sm:$0xff] }
 0x4cf   :  { %586 = vrot.lane.b32.xlu1 %v585_v21, %s1607_s7  ;;  %590 = vst.sshfl [vmem:[#allocation1] sm:$0xff pattern:$0x73625140] %v1766_v46 }
 0x4d3   :  { %v488_v28 = vpop.permute.xlu2 %487 }
 0x4d6   :  { %v592_v22 = vld [vmem:[#allocation1 + $0x1] ss:$4 sm:$0xff] }
 0x4d7   :  { %v1324_v23 = vrot.slane %v592_v22, 9  ;;  %599 = vst.sshfl [vmem:[#allocation1] sm:$0xff pattern:$0x73625140] %v1766_v46 }
 0x4d9   :  { %595 = vrot.lane.b32.xlu2 %v1324_v23, %s1609_s8 }
 0x4db   :  { %v464_v25 = vpop.permute.xlu0 %463 }
 0x4dc   :  { %466 = vst.msk [vmem:[#allocation2 + $0x2] sm:$0x1] %vm435_vm6, %v464_v25  ;;  %v1072_v25 = vld [vmem:[#allocation12 + $0x40] sm:$0x3] }
 0x4dd   :  { %1119 = vmatpush.xpose.msrb.mxu2 %v1072_v25 }
 0x4de   :  { %v601_v26 = vld [vmem:[#allocation1 + $0x2] ss:$4 sm:$0xff] }
 0x4df   :  { %604 = vst.sshfl [vmem:[#allocation1] sm:$0xff pattern:$0x73625140] %v1766_v46 }
 0x4e0   :  { %603 = vst.msk [vmem:[#allocation2 + $0xe] sm:$0x1] %vm409_vm3, %v601_v26  ;;  %v1073_v26 = vld [vmem:[#allocation12 + $0x48] sm:$0x3] }
 0x4e1   :  { %v479_v27 = vpop.permute.xlu1 %478  ;;  %1139 = vmatpush.xpose.msrb.mxu3 %v1073_v26 }
 0x4e2   :  { %481 = vst.msk [vmem:[#allocation2 + $0x4] sm:$0x1] %vm425_vm5, %v479_v27 }
 0x4e3   :  { %490 = vst.msk [vmem:[#allocation2 + $0x4] sm:$0x1] %vm435_vm6, %v488_v28  ;;  %v1064_v28 = vld [vmem:[#allocation12] sm:$0xff] }
 0x4e4   :  { %1120 = vmatpush.xpose.msrb.mxu2 %v1064_v28 }
 0x4e6   :  { %v606_v29 = vld [vmem:[#allocation1 + $0x2] ss:$4 sm:$0xff] }
 0x4e7   :  { %v1325_v32 = vrot.slane %v606_v29, 9  ;;  %613 = vst.sshfl [vmem:[#allocation1] sm:$0xff pattern:$0x73625140] %v1766_v46  ;;  %v1065_v29 = vld [vmem:[#allocation12 + $0x8] sm:$0xff] }
 0x4e8   :  { %1140 = vmatpush.xpose.msrb.mxu3 %v1065_v29 }
 0x4e9   :  { %609 = vrot.lane.b32.xlu2 %v1325_v32, %s1608_s1 }
 0x4ee   :  { %v615_v33 = vld [vmem:[#allocation1 + $0x3] ss:$4 sm:$0xff] }
 0x4ef   :  { %616 = vrot.lane.b32.xlu0 %v615_v33, %s1607_s7  ;;  %620 = vst.sshfl [vmem:[#allocation1] sm:$0xff pattern:$0x73625140] %v1766_v46 }
 0x4f6   :  { %v622_v34 = vld [vmem:[#allocation1 + $0x3] ss:$4 sm:$0xff] }
 0x4f7   :  { %v1326_v35 = vrot.slane %v622_v34, 9  ;;  %854 = vst.sshfl [vmem:[#allocation1] sm:$0xff pattern:$0x73625140] %v1732_v16 }
 0x4f9   :  { %625 = vrot.lane.b32.xlu1 %v1326_v35, %s1609_s8  ;;  %v1074_v35 = vld [vmem:[#allocation12 + $0x50] sm:$0x3] }
 0x4fa   :  { %1159 = vmatpush.xpose.msra.mxu2 %v1074_v35 }
 0x4fb   :  { %v502_v36 = vpop.permute.xlu1 %501 }
 0x4fc   :  { %504 = vst.msk [vmem:[#allocation2 + $0x6] sm:$0x1] %vm417_vm4, %v502_v36  ;;  %v1075_v36 = vld [vmem:[#allocation12 + $0x58] sm:$0x3] }
 0x4fd   :  { %1179 = vmatpush.xpose.msra.mxu3 %v1075_v36 }
 0x4fe   :  { %v856_v37 = vld [vmem:[#allocation1 + $0x1] ss:$4 sm:$0xff] }
 0x4ff   :  { %857 = vrot.lane.b32.xlu2 %v856_v37, %s1607_s7  ;;  %861 = vst.sshfl [vmem:[#allocation1] sm:$0xff pattern:$0x73625140] %v1732_v16  ;;  %v1066_v37 = vld [vmem:[#allocation12 + $0x10] sm:$0xff] }
 0x500   :  { %1160 = vmatpush.xpose.msra.mxu2 %v1066_v37 }
 0x501   :  { %v509_v38 = vpop.permute.xlu0 %508 }
 0x502   :  { %511 = vst.msk [vmem:[#allocation2 + $0x6] sm:$0x1] %vm425_vm5, %v509_v38  ;;  %v1067_v38 = vld [vmem:[#allocation12 + $0x18] sm:$0xff] }
 0x503   :  { %1180 = vmatpush.xpose.msra.mxu3 %v1067_v38 }
 0x506   :  { %v863_v39 = vld [vmem:[#allocation1 + $0x1] ss:$4 sm:$0xff] }
 0x507   :  { %v1338_v40 = vrot.slane %v863_v39, 9  ;;  %870 = vst.sshfl [vmem:[#allocation1] sm:$0xff pattern:$0x73625140] %v1732_v16 }
 0x509   :  { %866 = vrot.lane.b32.xlu0 %v1338_v40, %s1609_s8 }
 0x50b   :  { %v518_v41 = vpop.permute.xlu1 %517 }
 0x50c   :  { %520 = vst.msk [vmem:[#allocation2 + $0x6] sm:$0x1] %vm435_vm6, %v518_v41 }
 0x50e   :  { %v872_v42 = vld [vmem:[#allocation1 + $0x2] ss:$4 sm:$0xff] }
 0x50f   :  { %875 = vst.sshfl [vmem:[#allocation1] sm:$0xff pattern:$0x73625140] %v1732_v16 }
 0x510   :  { %874 = vst.msk [vmem:[#allocation2 + $0x3] sm:$0x1] %vm409_vm3, %v872_v42 }
 0x511   :  { %v533_v43 = vpop.permute.xlu0 %532 }
 0x512   :  { %535 = vst.msk [vmem:[#allocation2 + $0x8] sm:$0x1] %vm425_vm5, %v533_v43 }
 0x516   :  { %v877_v44 = vld [vmem:[#allocation1 + $0x2] ss:$4 sm:$0xff] }
 0x517   :  { %v1339_v45 = vrot.slane %v877_v44, 9  ;;  %884 = vst.sshfl [vmem:[#allocation1] sm:$0xff pattern:$0x73625140] %v1732_v16 }
 0x519   :  { %880 = vrot.lane.b32.xlu1 %v1339_v45, %s1608_s1  ;;  %v563_v51 = vpop.permute.xlu2 %562 }
 0x51b   :  { %v542_v46 = vpop.permute.xlu1 %541 }
 0x51c   :  { %544 = vst.msk [vmem:[#allocation2 + $0x8] sm:$0x1] %vm435_vm6, %v542_v46 }
 0x51e   :  { %v886_v47 = vld [vmem:[#allocation1 + $0x3] ss:$4 sm:$0xff] }
 0x51f   :  { %891 = vst.sshfl [vmem:[#allocation1] sm:$0xff pattern:$0x73625140] %v1732_v16 }
 0x521   :  { %887 = vrot.lane.b32.xlu1 %v886_v47, %s1607_s7 }
 0x526   :  { %v893_v48 = vld [vmem:[#allocation1 + $0x3] ss:$4 sm:$0xff] }
 0x527   :  { %v1340_v49 = vrot.slane %v893_v48, 9  ;;  %908 = vst.sshfl [vmem:[#allocation1] sm:$0xff pattern:$0x73625140] %v1742_v30  ;;  %v1076_v48 = vld [vmem:[#allocation12 + $0x60] sm:$0x3] }
 0x528   :  { %1199 = vmatpush.xpose.msra.mxu0 %v1076_v48 }
 0x529   :  { %896 = vrot.lane.b32.xlu2 %v1340_v49, %s1609_s8 }
 0x52b   :  { %v556_v50 = vpop.permute.xlu1 %555 }
 0x52c   :  { %558 = vst.msk [vmem:[#allocation2 + $0xa] sm:$0x1] %vm417_vm4, %v556_v50 }
 0x52d   :  { %565 = vst.msk [vmem:[#allocation2 + $0xa] sm:$0x1] %vm425_vm5, %v563_v51 }
 0x52e   :  { %v910_v52 = vld [vmem:[#allocation1 + $0x1] ss:$4 sm:$0xff] }
 0x52f   :  { %911 = vrot.lane.b32.xlu0 %v910_v52, %s1607_s7  ;;  %915 = vst.sshfl [vmem:[#allocation1] sm:$0xff pattern:$0x73625140] %v1742_v30  ;;  %v1068_v52 = vld [vmem:[#allocation12 + $0x20] sm:$0xff] }
 0x530   :  { %1200 = vmatpush.xpose.msra.mxu0 %v1068_v52 }
 0x533   :  { %v596_v54 = vpop.permute.xlu2 %595 }
 0x536   :  { %v917_v16 = vld [vmem:[#allocation1 + $0x1] ss:$4 sm:$0xff] }
 0x537   :  { %v1342_v53 = vrot.slane %v917_v16, 9  ;;  %924 = vst.sshfl [vmem:[#allocation1] sm:$0xff pattern:$0x73625140] %v1742_v30  ;;  %v1077_v16 = vld [vmem:[#allocation12 + $0x68] sm:$0x3] }
 0x539   :  { %920 = vrot.lane.b32.xlu1 %v1342_v53, %s1609_s8  ;;  %v1078_v53 = vld [vmem:[#allocation12 + $0x70] sm:$0x3] }
 0x53b   :  { %v572_v55 = vpop.permute.xlu0 %571 }
 0x53c   :  { %574 = vst.msk [vmem:[#allocation2 + $0xa] sm:$0x1] %vm435_vm6, %v572_v55  ;;  %v1070_v55 = vld [vmem:[#allocation12 + $0x30] sm:$0xff] }
 0x53e   :  { %v926_v56 = vld [vmem:[#allocation1 + $0x2] ss:$4 sm:$0xff] }
 0x53f   :  { %928 = vst.msk [vmem:[#allocation2 + $0x7] sm:$0x1] %vm409_vm3, %v926_v56 }
 0x540   :  { %929 = vst.sshfl [vmem:[#allocation1] sm:$0xff pattern:$0x73625140] %v1742_v30 }
 0x541   :  { %v587_v57 = vpop.permute.xlu1 %586 }
 0x542   :  { %589 = vst.msk [vmem:[#allocation2 + $0xc] sm:$0x1] %vm425_vm5, %v587_v57  ;;  %v1079_v57 = vld [vmem:[#allocation12 + $0x78] sm:$0x3] }
 0x543   :  { %598 = vst.msk [vmem:[#allocation2 + $0xc] sm:$0x1] %vm435_vm6, %v596_v54  ;;  %v610_v58 = vpop.permute.xlu2 %609  ;;  %v1069_v54 = vld [vmem:[#allocation12 + $0x28] sm:$0xff]  ;;  %1259 = vmatpush.xpose.msrb.mxu0 %v1079_v57 }
 0x544   :  { %612 = vst.msk [vmem:[#allocation2 + $0xe] sm:$0x1] %vm417_vm4, %v610_v58  ;;  %v1071_v58 = vld [vmem:[#allocation12 + $0x38] sm:$0xff] }
 0x547   :  { %v931_v59 = vld [vmem:[#allocation1 + $0x2] ss:$4 sm:$0xff]  ;;  %1260 = vmatpush.xpose.msrb.mxu0 %v1071_v58 }
 0x548   :  { %v1343_v60 = vrot.slane %v931_v59, 9  ;;  %938 = vst.sshfl [vmem:[#allocation1] sm:$0xff pattern:$0x73625140] %v1742_v30 }
 0x54a   :  { %934 = vrot.lane.b32.xlu1 %v1343_v60, %s1608_s1 }
 0x54f   :  { %v940_v61 = vld [vmem:[#allocation1 + $0x3] ss:$4 sm:$0xff] }
 0x550   :  { %941 = vrot.lane.b32.xlu2 %v940_v61, %s1607_s7  ;;  %945 = vst.sshfl [vmem:[#allocation1] sm:$0xff pattern:$0x73625140] %v1742_v30 }
 0x557   :  { %v947_v62 = vld [vmem:[#allocation1 + $0x3] ss:$4 sm:$0xff] }
 0x558   :  { %v1344_v63 = vrot.slane %v947_v62, 9  ;;  %962 = vst.sshfl [vmem:[#allocation1] sm:$0xff pattern:$0x73625140] %v1738_v24 }
 0x559   :  { %v858_v0 = vpop.permute.xlu2 %857 }
 0x55a   :  { %860 = vst.msk [vmem:[#allocation2 + $0x1] sm:$0x1] %vm425_vm5, %v858_v0  ;;  %950 = vrot.lane.b32.xlu0 %v1344_v63, %s1609_s8 }
 0x55f   :  { %v964_v1 = vld [vmem:[#allocation1 + $0x1] ss:$4 sm:$0xff] }
 0x560   :  { %965 = vrot.lane.b32.xlu2 %v964_v1, %s1607_s7  ;;  %969 = vst.sshfl [vmem:[#allocation1] sm:$0xff pattern:$0x73625140] %v1738_v24 }
 0x561   :  { %v617_v2 = vpop.permute.xlu0 %616 }
 0x562   :  { %619 = vst.msk [vmem:[#allocation2 + $0xe] sm:$0x1] %vm425_vm5, %v617_v2 }
 0x567   :  { %v971_v3 = vld [vmem:[#allocation1 + $0x1] ss:$4 sm:$0xff] }
 0x568   :  { %v1346_v4 = vrot.slane %v971_v3, 9  ;;  %978 = vst.sshfl [vmem:[#allocation1] sm:$0xff pattern:$0x73625140] %v1738_v24  ;;  %v1371_v3 = vld [vmem:[%s1923_s10] ss:$0 sm:$0xff] }
 0x569   :  { %s1610_s10 = smov [#allocation14]  }
 0x56a   :  { %974 = vrot.lane.b32.xlu0 %v1346_v4, %s1609_s8  ;;  %s1284_s13 = sshll.u32 %s1610_s10, 4  ;;  %s1285_s13 = int_to_ptr.vmem [resolvable:$true] %s1284_s13 }
 0x56b   :  { %v626_v30 = vpop.permute.xlu1 %625 }
 0x56c   :  { %628 = vst.msk [vmem:[#allocation2 + $0xe] sm:$0x1] %vm435_vm6, %v626_v30 }
 0x56f   :  { %v980_v5 = vld [vmem:[#allocation1 + $0x2] ss:$4 sm:$0xff] }
 0x570   :  { %982 = vst.msk [vmem:[#allocation2 + $0xb] sm:$0x1] %vm409_vm3, %v980_v5 }
 0x571   :  { %983 = vst.sshfl [vmem:[#allocation1] sm:$0xff pattern:$0x73625140] %v1738_v24 }
 0x578   :  { %v985_v6 = vld [vmem:[#allocation1 + $0x2] ss:$4 sm:$0xff] }
 0x579   :  { %v1347_v7 = vrot.slane %v985_v6, 9  ;;  %992 = vst.sshfl [vmem:[#allocation1] sm:$0xff pattern:$0x73625140] %v1738_v24 }
 0x57b   :  { %988 = vrot.lane.b32.xlu0 %v1347_v7, %s1608_s1  ;;  %v867_v8 = vpop.permute.xlu0 %866 }
 0x57c   :  { %869 = vst.msk [vmem:[#allocation2 + $0x1] sm:$0x1] %vm435_vm6, %v867_v8 }
 0x580   :  { %v994_v9 = vld [vmem:[#allocation1 + $0x3] ss:$4 sm:$0xff] }
 0x581   :  { %999 = vst.sshfl [vmem:[#allocation1] sm:$0xff pattern:$0x73625140] %v1738_v24  ;;  %995 = vrot.lane.b32.xlu1 %v994_v9, %s1607_s7 }
 0x583   :  { %v897_v14 = vpop.permute.xlu2 %896 }
 0x588   :  { %v1001_v10 = vld [vmem:[#allocation1 + $0x3] ss:$4 sm:$0xff] }
 0x589   :  { %1016 = vst.sshfl [vmem:[#allocation1] sm:$0xff pattern:$0x73625140] %v1748_v31  ;;  %v1348_v27 = vrot.slane %v1001_v10, 9 }
 0x58b   :  { %v881_v11 = vpop.permute.xlu1 %880 }
 0x58c   :  { %883 = vst.msk [vmem:[#allocation2 + $0x3] sm:$0x1] %vm417_vm4, %v881_v11 }
 0x590   :  { %v1018_v12 = vld [vmem:[#allocation1 + $0x1] ss:$4 sm:$0xff] }
 0x591   :  { %1023 = vst.sshfl [vmem:[#allocation1] sm:$0xff pattern:$0x73625140] %v1748_v31  ;;  %1019 = vrot.lane.b32.xlu0 %v1018_v12, %s1607_s7 }
 0x593   :  { %v888_v13 = vpop.permute.xlu1 %887 }
 0x594   :  { %890 = vst.msk [vmem:[#allocation2 + $0x3] sm:$0x1] %vm425_vm5, %v888_v13 }
 0x595   :  { %899 = vst.msk [vmem:[#allocation2 + $0x3] sm:$0x1] %vm435_vm6, %v897_v14 }
 0x598   :  { %v1025_v24 = vld [vmem:[#allocation1 + $0x1] ss:$4 sm:$0xff] }
 0x599   :  { %1032 = vst.sshfl [vmem:[#allocation1] sm:$0xff pattern:$0x73625140] %v1748_v31  ;;  %v1350_v22 = vrot.slane %v1025_v24, 9 }
 0x5a0   :  { %v1034_v15 = vld [vmem:[#allocation1 + $0x2] ss:$4 sm:$0xff] }
 0x5a1   :  { %v912_v17 = vpop.permute.xlu0 %911  ;;  %1037 = vst.sshfl [vmem:[#allocation1] sm:$0xff pattern:$0x73625140] %v1748_v31 }
 0x5a2   :  { %914 = vst.msk [vmem:[#allocation2 + $0x5] sm:$0x1] %vm425_vm5, %v912_v17 }
 0x5a3   :  { %1036 = vst.msk [vmem:[#allocation2 + $0xf] sm:$0x1] %vm409_vm3, %v1034_v15 }
 0x5a8   :  { %v1039_v18 = vld [vmem:[#allocation1 + $0x2] ss:$4 sm:$0xff] }
 0x5a9   :  { %v1351_v19 = vrot.slane %v1039_v18, 9  ;;  %1046 = vst.sshfl [vmem:[#allocation1] sm:$0xff pattern:$0x73625140] %v1748_v31 }
 0x5aa   :  { %v942_v23 = vpop.permute.xlu2 %941 }
 0x5ab   :  { %1042 = vrot.lane.b32.xlu1 %v1351_v19, %s1608_s1  ;;  %v921_v20 = vpop.permute.xlu1 %920 }
 0x5ac   :  { %923 = vst.msk [vmem:[#allocation2 + $0x5] sm:$0x1] %vm435_vm6, %v921_v20 }
 0x5b0   :  { %v1048_v21 = vld [vmem:[#allocation1 + $0x3] ss:$4 sm:$0xff] }
 0x5b1   :  { %1049 = vrot.lane.b32.xlu2 %v1048_v21, %s1607_s7  ;;  %1053 = vst.sshfl [vmem:[#allocation1] sm:$0xff pattern:$0x73625140] %v1748_v31 }
 0x5b3   :  { %1028 = vrot.lane.b32.xlu1 %v1350_v22, %s1609_s8 }
 0x5b8   :  { %v1055_v32 = vld [vmem:[#allocation1 + $0x3] ss:$4 sm:$0xff] }
 0x5b9   :  { %1004 = vrot.lane.b32.xlu2 %v1348_v27, %s1609_s8  ;;  %v1352_v33 = vrot.slane %v1055_v32, 9 }
 0x5ba   :  { %v966_v34 = vpop.permute.xlu2 %965 }
 0x5bb   :  { %968 = vst.msk [vmem:[#allocation2 + $0x9] sm:$0x1] %vm425_vm5, %v966_v34  ;;  %1058 = vrot.lane.b32.xlu0 %v1352_v33, %s1609_s8 }
 0x5bc   :  { %v935_v31 = vpop.permute.xlu1 %934 }
 0x5bd   :  { %937 = vst.msk [vmem:[#allocation2 + $0x7] sm:$0x1] %vm417_vm4, %v935_v31 }
 0x5be   :  { %944 = vst.msk [vmem:[#allocation2 + $0x7] sm:$0x1] %vm425_vm5, %v942_v23 }
 0x5cc   :  { %v951_v39 = vpop.permute.xlu0 %950 }
 0x5cd   :  { %953 = vst.msk [vmem:[#allocation2 + $0x7] sm:$0x1] %vm435_vm6, %v951_v39 }
 0x5d4   :  { %v1062_v40 = vld [vmem:[#allocation2] sm:$0xff] }
 0x5d5   :  { %1086 = vst [vmem:[#allocation1] ss:$4 sm:$0xff] %v1062_v40 }
 0x5dc   :  { %v975_v41 = vpop.permute.xlu0 %974  ;;  %v1089_v42 = vld.sshfl [vmem:[#allocation1] sm:$0xff pattern:$0x73625140]  ;;  %v1090_v43 = vld.sshfl [vmem:[#allocation1 + $0x8] sm:$0xff pattern:$0x73625140] }
 0x5dd   :  { %977 = vst.msk [vmem:[#allocation2 + $0x9] sm:$0x1] %vm435_vm6, %v975_v41  ;;  %1121 = vmatmul.f32.vlgmr.msrb.gmra.mxu2 %v1089_v42  ;;  %1141 = vmatmul.f32.vlgmr.msrb.gmra.mxu3 %v1090_v43  ;;  %v1091_v44 = vld.sshfl [vmem:[#allocation1 + $0x10] sm:$0xff pattern:$0x73625140] }
 0x5de   :  { %v1092_v45 = vld.sshfl [vmem:[#allocation1 + $0x18] sm:$0xff pattern:$0x73625140]  ;;  %1219 = vmatpush.xpose.msrb.mxu2 %v1077_v16  ;;  %1239 = vmatpush.xpose.msrb.mxu3 %v1078_v53 }
 0x5e2   :  { %1220 = vmatpush.xpose.msrb.mxu2 %v1069_v54  ;;  %1240 = vmatpush.xpose.msrb.mxu3 %v1070_v55 }
 0x5e5   :  { %1161 = vmatmul.f32.vlgmr.msra.gmra.mxu2 %v1091_v44  ;;  %1181 = vmatmul.f32.vlgmr.msra.gmra.mxu3 %v1092_v45 }
 0x5ed   :  { %v989_v46 = vpop.permute.xlu0 %988 }
 0x5ee   :  { %991 = vst.msk [vmem:[#allocation2 + $0xb] sm:$0x1] %vm417_vm4, %v989_v46 }
 0x5f3   :  { %v996_v47 = vpop.permute.xlu1 %995 }
 0x5f4   :  { %998 = vst.msk [vmem:[#allocation2 + $0xb] sm:$0x1] %vm425_vm5, %v996_v47 }
 0x603   :  { %v1020_v49 = vpop.permute.xlu0 %1019 }
 0x604   :  { %1022 = vst.msk [vmem:[#allocation2 + $0xd] sm:$0x1] %vm425_vm5, %v1020_v49 }
 0x60b   :  { %v1050_v50 = vpop.permute.xlu2 %1049 }
 0x613   :  { %v1005_v51 = vpop.permute.xlu2 %1004 }
 0x614   :  { %1007 = vst.msk [vmem:[#allocation2 + $0xb] sm:$0x1] %vm435_vm6, %v1005_v51 }
 0x61d   :  { %v1043_v56 = vpop.permute.xlu1 %1042 }
 0x61e   :  { %1045 = vst.msk [vmem:[#allocation2 + $0xf] sm:$0x1] %vm417_vm4, %v1043_v56 }
 0x61f   :  { %1052 = vst.msk [vmem:[#allocation2 + $0xf] sm:$0x1] %vm425_vm5, %v1050_v50 }
 0x625   :  { %v1029_v59 = vpop.permute.xlu1 %1028 }
 0x626   :  { %1031 = vst.msk [vmem:[#allocation2 + $0xd] sm:$0x1] %vm435_vm6, %v1029_v59 }
 0x62d   :  { %v1059_v60 = vpop.permute.xlu0 %1058 }
 0x62e   :  { %1061 = vst.msk [vmem:[#allocation2 + $0xf] sm:$0x1] %vm435_vm6, %v1059_v60 }
 0x635   :  { %v1063_v61 = vld [vmem:[#allocation2 + $0x8] sm:$0xff] }
 0x636   :  { %1088 = vst [vmem:[#allocation1 + $0x20] ss:$4 sm:$0xff] %v1063_v61 }
 0x63d   :  { %v1093_v62 = vld.sshfl [vmem:[#allocation1 + $0x20] sm:$0xff pattern:$0x73625140]  ;;  %v1094_v63 = vld.sshfl [vmem:[#allocation1 + $0x28] sm:$0xff pattern:$0x73625140] }
 0x63e   :  { %1201 = vmatmul.f32.vlgmr.msra.gmra.mxu0 %v1093_v62  ;;  %1221 = vmatmul.f32.vlgmr.msrb.gmra.mxu2 %v1094_v63  ;;  %v1095_v0 = vld.sshfl [vmem:[#allocation1 + $0x30] sm:$0xff pattern:$0x73625140]  ;;  %v1096_v1 = vld.sshfl [vmem:[#allocation1 + $0x38] sm:$0xff pattern:$0x73625140] }
 0x63f   :  { %1241 = vmatmul.f32.vlgmr.msrb.gmra.mxu3 %v1095_v0 }
 0x646   :  { %1261 = vmatmul.f32.vlgmr.msrb.gmra.mxu0 %v1096_v1 }
 0x660   :  { %v1122_v2 = vpop.f32.mrf.mxu2  ;;  %v1142_v4 = vpop.f32.mrf.mxu3 }
 0x661   :  { %v1123_v30 = vadd.f32 %v1371_v3, %v1122_v2 }
 0x663   :  { %v1143_v6 = vadd.f32 %v1142_v4, %v1123_v30 }
 0x668   :  { %v1162_v5 = vpop.f32.mrf.mxu2  ;;  %v1182_v8 = vpop.f32.mrf.mxu3 }
 0x669   :  { %v1163_v7 = vadd.f32 %v1162_v5, %v1143_v6 }
 0x66b   :  { %v1183_v10 = vadd.f32 %v1182_v8, %v1163_v7 }
 0x6bb   :  { %v1202_v9 = vpop.f32.mrf.mxu0 }
 0x6bc   :  { %v1203_v11 = vadd.f32 %v1202_v9, %v1183_v10 }
 0x6c1   :  { %v1222_v12 = vpop.f32.mrf.mxu2 }
 0x6c2   :  { %v1223_v13 = vadd.f32 %v1222_v12, %v1203_v11  ;;  %v1242_v14 = vpop.f32.mrf.mxu3 }
 0x6c3   :  { %v1262_v15 = vpop.f32.mrf.mxu0 }
 0x6c4   :  { %v1243_v24 = vadd.f32 %v1242_v14, %v1223_v13 }
 0x6c6   :  { %v1263_v17 = vadd.f32 %v1262_v15, %v1243_v24 }
 0x6c8   :  { %v1266_v18 = vsel %vm1265_vm7, %v1263_v17, -inf }
 0x6c9   :  { %1267 = vmax.xlane.f32.xlu2 %v1266_v18 }
 0x73c   :  { %v1268_v19 = vpop.xlane.xlu2 %1267 }
 0x73d   :  { %v1269_v20 = vsub.f32 %v1263_v17, %v1268_v19 }
 0x73f   :  { %v1270_v21 = vmul.f32 1.442695, %v1269_v20 }
 0x741   :  { %1416 = vpow2.f32 %v1270_v21 }
 0x747   :  { %v1417_v22 = vpop.eup %1416 }
 0x748   :  { %v1272_v23 = vsel %vm1265_vm7, %v1417_v22, 0.0 }
 0x749   :  { %1273 = vadd.xlane.f32.xlu1 %v1272_v23 }
 0x7bc   :  { %v1274_v25 = vpop.xlane.xlu1 %1273 }
 0x7bd   :  { %1418 = vlog2.f32 %v1274_v25 }
 0x7c3   :  { %v1419_v26 = vpop.eup %1418 }
 0x7c4   :  { %v1276_v27 = vmul.f32 0.6931472, %v1419_v26 }
 0x7c6   :  { %v1277_v28 = vsub.f32 %v1269_v20, %v1276_v27 }
 0x7c8   :  { %1278 = vst.msk [vmem:[#allocation14] sm:$0x3] %vm1265_vm7, %v1277_v28 }
 0x7c9   :  { %1289 = dma.vmem_to_hbm [thread:$0]  %s1285_s13, 32, %s1287_s16, [#allocation5]  }
 0x7ca   :  { %1596 = dma.done.wait [#allocation5], 32  }
 0x7cb   :  { %1597 = vsyncadd [#allocation5], 4294967264 }
 0x7cc   :  { %1294 = vsyncpa [#allocation4], 1 }
 0x7cd   :  { %1295 = vsyncpa [#allocation7], 1 }
 0x7ce   :  { %1296 = vsyncpa [#allocation10], 1 }
 0x7cf   :  { %1297 = vsyncpa [#allocation13], 1 }
 0x7d0   :  { %1298 = vsyncpa [#allocation5], 1 }

</bundles_post_ra>
